<compile_context>
chip_gen: v7x
topology: tpu7x:2x2x1
jax: 0.10.0
libtpu: 0.0.40
codegen_flags: <defaults>
</compile_context>

<pallas_src>
import functools

import jax
import jax.numpy as jnp
from jax.experimental import pallas as pl
from jax.experimental.pallas import tpu as pltpu

C1 = 512       # Head(512) input channels
C_HID = 1280   # Classify hidden width c_
CPAD = 128     # padded class dimension (max real c2 = 25)

HEAD_KEYS = ["length", "color", "sleeve_length", "material", "print", "neckline", "fit"]
HEAD_NCLS = {"length": 3, "color": 20, "sleeve_length": 5, "material": 25,
             "print": 14, "neckline": 12, "fit": 6}
BOTTOM_KEYS = ["length", "color", "material", "print", "fit"]
NUM_HEADS = len(HEAD_KEYS)


def classify_heads_kernel(x_ref, wc_ref, bc_ref, wl_ref, bl_ref, o_ref, *, batch, hw):
    """One grid step == one Classify head.

    x_ref  : (BHW, C1)        flattened pixels, bf16 (shared by all heads)
    wc_ref : (1, C1, C_HID)   folded Conv1x1+BN weight, bf16
    bc_ref : (1, 1,  C_HID)   folded Conv1x1+BN bias,   f32
    wl_ref : (1, C_HID, CPAD) Linear weight, bf16 (padded lanes zeroed)
    bl_ref : (1, 1,  CPAD)    Linear bias,   f32  (padded lanes = -1e30)
    o_ref  : (1, B,  CPAD)    softmax probabilities (padded lanes == 0)
    """
    # 1x1 conv (+ folded BN) as a bf16 MXU matmul with f32 accumulation.
    z = jnp.dot(x_ref[...], wc_ref[0], preferred_element_type=jnp.float32) + bc_ref[0]
    a = z * jax.nn.sigmoid(z)                                            # SiLU in f32

    # AdaptiveAvgPool2d(1): per-image mean over spatial positions (XLU reduce).
    pooled = a.reshape(batch, hw, C_HID).sum(axis=1) * (1.0 / hw)        # (B, C_HID) f32

    # Linear head (class dim padded to CPAD lanes), bf16 operands, f32 accum.
    logits = jnp.dot(pooled.astype(jnp.bfloat16), wl_ref[0],
                     preferred_element_type=jnp.float32) + bl_ref[0]     # (B, CPAD) f32

    # Softmax over classes (padded lanes have -1e30 bias -> exp == 0), f32 math.
    m = jnp.max(logits, axis=-1, keepdims=True)
    e = jnp.exp(logits - m)
    o_ref[0] = e / jnp.sum(e, axis=-1, keepdims=True)


def run_classify_heads(x_flat_bf16, wc, bc, wl, bl, *, batch, hw):
    BHW, _ = x_flat_bf16.shape
    kernel = functools.partial(classify_heads_kernel, batch=batch, hw=hw)
    return pl.pallas_call(
        kernel,
        out_shape=jax.ShapeDtypeStruct((NUM_HEADS, batch, CPAD), jnp.float32),
        grid_spec=pltpu.PrefetchScalarGridSpec(
            num_scalar_prefetch=0,
            grid=(NUM_HEADS,),
            in_specs=[
                # Block index is constant across heads -> x is DMA'd only once.
                pl.BlockSpec((BHW, C1), lambda h: (0, 0)),
                pl.BlockSpec((1, C1, C_HID), lambda h: (h, 0, 0)),
                pl.BlockSpec((1, 1, C_HID), lambda h: (h, 0, 0)),
                pl.BlockSpec((1, C_HID, CPAD), lambda h: (h, 0, 0)),
                pl.BlockSpec((1, 1, CPAD), lambda h: (h, 0, 0)),
            ],
            out_specs=pl.BlockSpec((1, batch, CPAD), lambda h: (h, 0, 0)),
        ),
        compiler_params=pltpu.CompilerParams(
            # Heads are independent -> shard across v7x's 2 TensorCores.
            dimension_semantics=("parallel",),
            # Working set (bf16 weights, double-buffered) is < 4 MiB.
            vmem_limit_bytes=16 << 20,
        ),
    )(x_flat_bf16, wc, bc, wl, bl)


def init_params(key):
    """Deterministic synthetic parameters (BN folded into conv). Weights bf16."""
    k1, k2, k3, k4 = jax.random.split(key, 4)
    wc = jax.random.normal(k1, (NUM_HEADS, C1, C_HID), jnp.float32) / jnp.sqrt(C1)
    bc = jax.random.normal(k2, (NUM_HEADS, 1, C_HID), jnp.float32) * 0.1
    wl = jax.random.normal(k3, (NUM_HEADS, C_HID, CPAD), jnp.float32) / jnp.sqrt(C_HID)
    bl = jax.random.normal(k4, (NUM_HEADS, 1, CPAD), jnp.float32) * 0.1
    # Mask padded class lanes: zero weights, -inf-ish bias -> exact softmax.
    ncls = jnp.array([HEAD_NCLS[k] for k in HEAD_KEYS], jnp.int32)          # (7,)
    valid = jnp.arange(CPAD)[None, None, :] < ncls[:, None, None]           # (7,1,CPAD)
    wl = jnp.where(valid, wl, 0.0)
    bl = jnp.where(valid, bl, -1e30)
    # Weights streamed as bf16 (halves HBM traffic; kernel is weight-stream bound).
    wc = wc.astype(jnp.bfloat16)
    wl = wl.astype(jnp.bfloat16)        # zero-masked lanes survive the cast exactly
    return wc, bc, wl, bl


def head_forward(x_nchw, params):
    """YOLO_MultiClass.Head forward on backbone features (eval-mode Classify)."""
    wc, bc, wl, bl = params
    B, C, H, W = x_nchw.shape
    assert C == C1
    # NCHW -> (B*H*W, C) pixels; cast to the MXU operand dtype once, outside.
    x_flat = jnp.transpose(x_nchw, (0, 2, 3, 1)).reshape(B * H * W, C1)
    x_flat = x_flat.astype(jnp.bfloat16)
    out_pad = run_classify_heads(x_flat, wc, bc, wl, bl, batch=B, hw=H * W)  # (7, B, CPAD)
    per_key = {k: out_pad[i, :, :HEAD_NCLS[k]] for i, k in enumerate(HEAD_KEYS)}
    # outer/top/bottom/onepiece all reference the SAME shared Classify modules,
    # so the per-key outputs are identical (bottom uses a key subset).
    return {
        "outer": dict(per_key),
        "top": dict(per_key),
        "bottom": {k: per_key[k] for k in BOTTOM_KEYS},
        "onepiece": dict(per_key),
    }


def head_forward_ref(x_nchw, params):
    """Plain-JAX reference (same bf16 weights / f32 accumulation) for checking."""
    wc, bc, wl, bl = params
    B, C, H, W = x_nchw.shape
    x_flat = jnp.transpose(x_nchw, (0, 2, 3, 1)).reshape(B * H * W, C1)
    x_bf16 = x_flat.astype(jnp.bfloat16)
    per_key = {}
    for i, kname in enumerate(HEAD_KEYS):
        n = HEAD_NCLS[kname]
        z = jnp.dot(x_bf16, wc[i], preferred_element_type=jnp.float32) + bc[i]
        a = z * jax.nn.sigmoid(z)
        pooled = a.reshape(B, H * W, C_HID).mean(axis=1)
        logits = jnp.dot(pooled.astype(jnp.bfloat16), wl[i][:, :n],
                         preferred_element_type=jnp.float32) + bl[i][0, :n]
        per_key[kname] = jax.nn.softmax(logits, axis=-1)
    return per_key


if __name__ == "__main__":
    key = jax.random.PRNGKey(0)
    kx, kp = jax.random.split(key)

    # Small backbone feature map consistent with Head(512): (B, 512, H, W).
    B, H, W = 2, 4, 4
    x = jax.random.normal(kx, (B, C1, H, W), jnp.float32)

    params = init_params(kp)

    out = head_forward(x, params)
    out = jax.block_until_ready(out)

    # Correctness check against plain-JAX reference (same bf16 weight path).
    ref = head_forward_ref(x, params)
    for k in HEAD_KEYS:
        assert out["outer"][k].shape == (B, HEAD_NCLS[k])
        assert jnp.allclose(out["outer"][k], ref[k], atol=1e-4, rtol=1e-4)
        assert jnp.allclose(out["top"][k], ref[k], atol=1e-4, rtol=1e-4)
        assert jnp.allclose(out["onepiece"][k], ref[k], atol=1e-4, rtol=1e-4)
    for k in BOTTOM_KEYS:
        assert jnp.allclose(out["bottom"][k], ref[k], atol=1e-4, rtol=1e-4)

    print("KERNEL_OK")
</pallas_src>

<mosaic_0001>
module attributes {stable_mosaic.version = 11 : i64} {
  func.func @classify_heads_kernel(%arg0: i32, %arg1: memref<32x512xbf16, #tpu.memory_space<vmem>>, %arg2: memref<1x512x1280xbf16, #tpu.memory_space<vmem>>, %arg3: memref<1x1x1280xf32, #tpu.memory_space<vmem>>, %arg4: memref<1x1280x128xbf16, #tpu.memory_space<vmem>>, %arg5: memref<1x1x128xf32, #tpu.memory_space<vmem>>, %arg6: memref<1x2x128xf32, #tpu.memory_space<vmem>>) attributes {dimension_semantics = [#tpu.dimension_semantics<parallel>], iteration_bounds = array<i64: 7>, scalar_prefetch = 0 : i64, scratch_operands = 0 : i64, tpu.core_type = #tpu.core_type<tc>, window_params = [{pipeline_mode = #tpu.pipeline_mode<synchronous>, transform_indices = @transform_0, window_bounds = array<i64: 32, 512>}, {transform_indices = @transform_1, window_bounds = array<i64: 1, 512, 1280>}, {transform_indices = @transform_2, window_bounds = array<i64: 1, 1, 1280>}, {transform_indices = @transform_3, window_bounds = array<i64: 1, 1280, 128>}, {transform_indices = @transform_4, window_bounds = array<i64: 1, 1, 128>}, {transform_indices = @transform_5, window_bounds = array<i64: 1, 2, 128>}]} {
    %c0 = arith.constant 0 : index
    %c0_0 = arith.constant 0 : index
    %0 = vector.load %arg1[%c0, %c0_0] : memref<32x512xbf16, #tpu.memory_space<vmem>>, vector<32x512xbf16>
    %c0_1 = arith.constant 0 : index
    %c0_2 = arith.constant 0 : index
    %c0_3 = arith.constant 0 : index
    %1 = vector.load %arg2[%c0_1, %c0_2, %c0_3] : memref<1x512x1280xbf16, #tpu.memory_space<vmem>>, vector<1x512x1280xbf16>
    %2 = vector.shape_cast %1 : vector<1x512x1280xbf16> to vector<512x1280xbf16>
    %cst = arith.constant dense<0.000000e+00> : vector<32x1280xf32>
    %3 = tpu.matmul %0, %2, %cst {dimension_numbers = #tpu.dot_dimension_numbers<[1], [0], [0], [1], [0, 0, 1, 1], [], []>} : vector<32x512xbf16>, vector<512x1280xbf16>, vector<32x1280xf32> -> vector<32x1280xf32>
    %c0_4 = arith.constant 0 : index
    %c0_5 = arith.constant 0 : index
    %c0_6 = arith.constant 0 : index
    %4 = vector.load %arg3[%c0_4, %c0_5, %c0_6] : memref<1x1x1280xf32, #tpu.memory_space<vmem>>, vector<1x1x1280xf32>
    %5 = vector.shape_cast %4 : vector<1x1x1280xf32> to vector<1x1280xf32>
    %6 = vector.broadcast %5 : vector<1x1280xf32> to vector<32x1280xf32>
    %7 = arith.addf %3, %6 : vector<32x1280xf32>
    %8 = arith.negf %7 : vector<32x1280xf32>
    %9 = math.exp %8 : vector<32x1280xf32>
    %cst_7 = arith.constant 1.000000e+00 : f32
    %10 = vector.broadcast %cst_7 : f32 to vector<32x1280xf32>
    %11 = arith.addf %10, %9 : vector<32x1280xf32>
    %12 = arith.divf %10, %11 : vector<32x1280xf32>
    %13 = arith.mulf %7, %12 : vector<32x1280xf32>
    %14 = vector.shape_cast %13 : vector<32x1280xf32> to vector<2x16x1280xf32>
    %cst_8 = arith.constant dense<0.000000e+00> : vector<2x1280xf32>
    %15 = vector.multi_reduction <add>, %14, %cst_8 [1] : vector<2x16x1280xf32> to vector<2x1280xf32>
    %cst_9 = arith.constant 6.250000e-02 : f32
    %16 = vector.broadcast %cst_9 : f32 to vector<2x1280xf32>
    %17 = arith.mulf %15, %16 : vector<2x1280xf32>
    %18 = arith.truncf %17 : vector<2x1280xf32> to vector<2x1280xbf16>
    %c0_10 = arith.constant 0 : index
    %c0_11 = arith.constant 0 : index
    %c0_12 = arith.constant 0 : index
    %19 = vector.load %arg4[%c0_10, %c0_11, %c0_12] : memref<1x1280x128xbf16, #tpu.memory_space<vmem>>, vector<1x1280x128xbf16>
    %20 = vector.shape_cast %19 : vector<1x1280x128xbf16> to vector<1280x128xbf16>
    %cst_13 = arith.constant dense<0.000000e+00> : vector<2x128xf32>
    %21 = tpu.matmul %18, %20, %cst_13 {dimension_numbers = #tpu.dot_dimension_numbers<[1], [0], [0], [1], [0, 0, 1, 1], [], []>} : vector<2x1280xbf16>, vector<1280x128xbf16>, vector<2x128xf32> -> vector<2x128xf32>
    %c0_14 = arith.constant 0 : index
    %c0_15 = arith.constant 0 : index
    %c0_16 = arith.constant 0 : index
    %22 = vector.load %arg5[%c0_14, %c0_15, %c0_16] : memref<1x1x128xf32, #tpu.memory_space<vmem>>, vector<1x1x128xf32>
    %23 = vector.shape_cast %22 : vector<1x1x128xf32> to vector<1x128xf32>
    %24 = vector.broadcast %23 : vector<1x128xf32> to vector<2x128xf32>
    %25 = arith.addf %21, %24 : vector<2x128xf32>
    %cst_17 = arith.constant dense<0xFF800000> : vector<2xf32>
    %26 = vector.multi_reduction <maximumf>, %25, %cst_17 [1] : vector<2x128xf32> to vector<2xf32>
    %27 = vector.shape_cast %26 : vector<2xf32> to vector<2x1xf32>
    %28 = vector.broadcast %27 : vector<2x1xf32> to vector<2x128xf32>
    %29 = arith.subf %25, %28 : vector<2x128xf32>
    %30 = math.exp %29 : vector<2x128xf32>
    %cst_18 = arith.constant dense<0.000000e+00> : vector<2xf32>
    %31 = vector.multi_reduction <add>, %30, %cst_18 [1] : vector<2x128xf32> to vector<2xf32>
    %32 = vector.shape_cast %31 : vector<2xf32> to vector<2x1xf32>
    %33 = vector.broadcast %32 : vector<2x1xf32> to vector<2x128xf32>
    %34 = arith.divf %30, %33 : vector<2x128xf32>
    %c0_19 = arith.constant 0 : index
    %c0_20 = arith.constant 0 : index
    %c0_21 = arith.constant 0 : index
    %35 = vector.load %arg6[%c0_19, %c0_20, %c0_21] : memref<1x2x128xf32, #tpu.memory_space<vmem>>, vector<1x2x128xf32>
    %36 = vector.shape_cast %35 : vector<1x2x128xf32> to vector<2x128xf32>
    %37 = vector.shape_cast %34 : vector<2x128xf32> to vector<1x2x128xf32>
    tpu.vector_store %arg6[%c0_19, %c0_20, %c0_21], %37 {strides = array<i32>} : memref<1x2x128xf32, #tpu.memory_space<vmem>>, vector<1x2x128xf32>,
    return
  }
  func.func @transform_0(%arg0: i32) -> (i32, i32) {
    %c0_i32 = arith.constant 0 : i32
    %c0_i32_0 = arith.constant 0 : i32
    %c0_i32_1 = arith.constant 0 : i32
    return %c0_i32, %c0_i32_0 : i32, i32
  }
  func.func @transform_1(%arg0: i32) -> (i32, i32, i32) {
    %c0_i32 = arith.constant 0 : i32
    %c0_i32_0 = arith.constant 0 : i32
    %c0_i32_1 = arith.constant 0 : i32
    return %arg0, %c0_i32, %c0_i32_0 : i32, i32, i32
  }
  func.func @transform_2(%arg0: i32) -> (i32, i32, i32) {
    %c0_i32 = arith.constant 0 : i32
    %c0_i32_0 = arith.constant 0 : i32
    %c0_i32_1 = arith.constant 0 : i32
    return %arg0, %c0_i32, %c0_i32_0 : i32, i32, i32
  }
  func.func @transform_3(%arg0: i32) -> (i32, i32, i32) {
    %c0_i32 = arith.constant 0 : i32
    %c0_i32_0 = arith.constant 0 : i32
    %c0_i32_1 = arith.constant 0 : i32
    return %arg0, %c0_i32, %c0_i32_0 : i32, i32, i32
  }
  func.func @transform_4(%arg0: i32) -> (i32, i32, i32) {
    %c0_i32 = arith.constant 0 : i32
    %c0_i32_0 = arith.constant 0 : i32
    %c0_i32_1 = arith.constant 0 : i32
    return %arg0, %c0_i32, %c0_i32_0 : i32, i32, i32
  }
  func.func @transform_5(%arg0: i32) -> (i32, i32, i32) {
    %c0_i32 = arith.constant 0 : i32
    %c0_i32_0 = arith.constant 0 : i32
    %c0_i32_1 = arith.constant 0 : i32
    return %arg0, %c0_i32, %c0_i32_0 : i32, i32, i32
  }
}

</mosaic_0001>

<bundles_post_ra>
// kernel: tpu_custom_call.1
= control target key start
LH: loop header
LB: loop body
LE: loop exit
PB: predicated region body
PF: predicated region fallthrough
CT: control target
= control target key end

     0   :  { %s7176_s0 = inlined_call_operand.hbm [shape: bf16[32,512], index: 0, kind: input, shape index: {}]   ;;  %s7177_s1 = inlined_call_operand.hbm [shape: bf16[7,512,1280], index: 1, kind: input, shape index: {}]   ;;  %s7178_s2 = inlined_call_operand.hbm [shape: f32[7,1,1280], index: 2, kind: input, shape index: {}]   ;;  %s7179_s3 = inlined_call_operand.hbm [shape: bf16[7,1280,128], index: 3, kind: input, shape index: {}]   ;;  %s7180_s4 = inlined_call_operand.hbm [shape: f32[7,1,128], index: 4, kind: input, shape index: {}]   ;;  %s7181_s5 = inlined_call_operand.hbm [shape: f32[7,2,128], index: 5, kind: output, shape index: {}]  }
   0x1   :  { %7197 = sst [smem:[#allocation22_spill]] %s7177_s1 }
   0x2   :  { %7198 = sst [smem:[#allocation23_spill]] %s7179_s3 }
   0x3   :  { %10 = vsyncpa [#allocation3], 0 }
   0x4   :  { %11 = vsyncpa [#allocation6], 0 }
   0x5   :  { %13 = vsyncpa [#allocation6 + $0x1], 0 }
   0x6   :  { %14 = vsyncpa [#allocation9], 0 }
   0x7   :  { %16 = vsyncpa [#allocation9 + $0x1], 0 }
   0x8   :  { %17 = vsyncpa [#allocation4], 0 }
   0x9   :  { %19 = vsyncpa [#allocation4 + $0x1], 0  ;;  %s6215_s18 = smov 0   ;;  %s6217_s19 = smov 0  }
   0xa   :  { %s6219_s20 = smov 0   ;;  %s6221_s21 = smov 0  }
   0xb LB: > { %7199 = sst [smem:[#allocation16_spill]] %s6159_s18  ;;  %s6236_s22 = sadd.s32 1, %s6171_s21   ;;  %s6171_s21 = sphi %s6221_s21, %s7227_s21   ;;  %s6167_s20 = sphi %s6219_s20, %s7229_s20   ;;  %s6163_s19 = sphi %s6217_s19, %s7231_s19   ;;  %s6159_s18 = sphi %s6215_s18, %s7230_s18  }
   0xc   : > { %7200 = sst [smem:[#allocation17_spill]] %s6167_s20  ;;  %s53_s23 = sadd.s32 1, %s6167_s20 }
   0xd   : > { %7201 = sst [smem:[#allocation18_spill]] %s6171_s21  ;;  %s50_s24 = ssub.s32 %s6171_s21, %s6236_s22 }
   0xe   : > { %7202 = sst [smem:[#allocation19_spill]] %s6236_s22  ;;  %p7182_p0 = scmp.ne.s32.totalorder %s6167_s20, %s6163_s19 }
   0xf   : > { %p51_p1 = scmp.eq.s32.totalorder %s50_s24, 0  ;;  %p61_p2 = scmp.eq.s32.totalorder %s6171_s21, 0 }
  0x10   : > { %p5163_p3 = scmp.lt.s32.totalorder %s6171_s21, 7  ;;  %s207_s26 = sand.u32 1, %s6171_s21  }
  0x11   : > { %s6246_s25 = scalar_select %p51_p1, %s6167_s20, %s53_s23  }
  0x12   : > { %p62_p4 = por %p61_p2, %p7182_p0  ;;  %s6253_s27 = sand.u32 1, %s6167_s20  }
  0x13   : > { %7203 = sst [smem:[#allocation20_spill]] %s6246_s25  ;;  %s5118_s28 = smul.u32 2560, %s6253_s27 }
  0x14   : > { %p6256_p5 = pnand %p5163_p3, %p62_p4  ;;  %s5119_s30 = smul.u32 40960, %s6171_s21 }
  0x15   : > { %s7205_s1 = sld [smem:[#allocation22_spill]]  ;;  %s211_s9 = scalar_lea.vmem [#allocation5], %s5118_s28 }
  0x16   : > { %s7204_s29 = scalar_select %p6256_p5, 1, 0 }
  0x17   : > { %s218_s10 = sshll.u32 %s211_s9, 4  ;;  %s6270_s11 = scalar_lea.sflag [#allocation6], %s207_s26  ;;  %s6266_s10 = int_to_ptr.vmem [resolvable:$true] %s218_s10 }
  0x18   : > { %p6276_p7 = pneg %p6256_p5 }
  0x1a   : > { %s7206_s13 = scalar_select %p6276_p7, 1, 0 }
  0x1b   : > { %s6264_s8 = scalar_lea.hbm %s7205_s1, %s5119_s30  ;;  %s5954_s16 = scalar_lea.hbm %s7205_s1, 286720 }
  0x1c   : > { %s5949_s12 = scalar_lea.hbm %s6264_s8, 40960  ;;  %p5955_p10 = scmp.lt.u32.totalorder %s6264_s8, %s7205_s1 }
  0x1d   : > { %p5950_p6 = scmp.ne.s32.totalorder %s6264_s8, %s5949_s12  ;;  %p5956_p11 = scmp.lt.u32.totalorder %s5954_s16, %s5949_s12 }
  0x1e   : > { %p5958_p13 = scmp.lt.u32.totalorder %s5949_s12, %s6264_s8 }
  0x1f   : > { %p5952_p8 = pnand %p6276_p7, %p5950_p6  ;;  %p5957_p12 = por %p5956_p11, %p5955_p10 }
  0x21   : > { %p5953_p9 = pneg %p5952_p8  ;;  %p5959_p1 = por %p5958_p13, %p5957_p12 }
  0x23   : > { %p5960_p2 = pnand %p5959_p1, %p5953_p9 }
  0x25   : > { %5963 = shalt.err (!%p5960_p2)
}
  0x26   : > { %s5964_s24 = scalar_lea.vmem %s6266_s10, 40960  ;;  %s6173_s28 = smov [#allocation5]  }
  0x27   : > { %p5965_p3 = scmp.ne.s32.totalorder %s6266_s10, %s5964_s24  ;;  %s5969_s30 = sshll.u32 %s6173_s28, 4  ;;  %s5970_s30 = int_to_ptr.vmem [resolvable:$false] %s5969_s30 }
  0x28   : > { %s5971_s6 = scalar_lea.vmem %s5970_s30, 81920  ;;  %p5972_p8 = scmp.lt.s32.totalorder %s6266_s10, %s5970_s30 }
  0x29   : > { %p5967_p4 = pnand %p5965_p3, %p6276_p7  ;;  %p5973_p0 = scmp.lt.s32.totalorder %s5971_s6, %s5964_s24 }
  0x2b   : > { %p5968_p6 = pneg %p5967_p4  ;;  %p5974_p10 = por %p5973_p0, %p5972_p8 }
  0x2d   : > { %p5975_p11 = pnand %p5974_p10, %p5968_p6 }
  0x2f   : > { %5978 = shalt.err (!%p5975_p11)
}
  0x30   : > { %s6174_s7 = smov 640   ;;  %s6175_s9 = smov 40  }
  0x31   : > { %5148 = dma.hbm_to_vmem [thread:$0]  (!%p6256_p5), %s6264_s8, 40960, %s6266_s10, %s6270_s11, %s6174_s7, %s6174_s7, %s6175_s9  }
  0x32   : > { %s5122_s12 = smul.u32 640, %s6253_s27  ;;  %s7207_s3 = sld [smem:[#allocation23_spill]] }
  0x33   : > { %s5123_s14 = smul.u32 10240, %s6171_s21  ;;  %s6311_s28 = scalar_lea.sflag [#allocation9], %s207_s26 }
  0x34   : > { %s251_s23 = scalar_lea.vmem [#allocation8], %s5122_s12 }
  0x35   : > { %s258_s24 = sshll.u32 %s251_s23, 4  ;;  %s6307_s24 = int_to_ptr.vmem [resolvable:$true] %s258_s24 }
  0x38   : > { %s6305_s17 = scalar_lea.hbm %s7207_s3, %s5123_s14  ;;  %s5984_s6 = scalar_lea.hbm %s7207_s3, 71680 }
  0x39   : > { %s5979_s30 = scalar_lea.hbm %s6305_s17, 10240  ;;  %p5985_p13 = scmp.lt.u32.totalorder %s6305_s17, %s7207_s3 }
  0x3a   : > { %p5980_p0 = scmp.ne.s32.totalorder %s6305_s17, %s5979_s30  ;;  %p5986_p1 = scmp.lt.u32.totalorder %s5984_s6, %s5979_s30 }
  0x3b   : > { %p5988_p3 = scmp.lt.u32.totalorder %s5979_s30, %s6305_s17 }
  0x3c   : > { %p5982_p9 = pnand %p5980_p0, %p6276_p7  ;;  %p5987_p2 = por %p5986_p1, %p5985_p13 }
  0x3e   : > { %p5983_p12 = pneg %p5982_p9  ;;  %p5989_p4 = por %p5988_p3, %p5987_p2 }
  0x40   : > { %p5990_p6 = pnand %p5989_p4, %p5983_p12 }
  0x42   : > { %5993 = shalt.err (!%p5990_p6)
}
  0x43   : > { %s5994_s26 = scalar_lea.vmem %s6307_s24, 10240  ;;  %s6176_s12 = smov [#allocation8]  }
  0x44   : > { %p5995_p8 = scmp.ne.s32.totalorder %s6307_s24, %s5994_s26  ;;  %s5999_s14 = sshll.u32 %s6176_s12, 4  ;;  %s6000_s14 = int_to_ptr.vmem [resolvable:$false] %s5999_s14 }
  0x45   : > { %s6001_s15 = scalar_lea.vmem %s6000_s14, 20480  ;;  %p6002_p0 = scmp.lt.s32.totalorder %s6307_s24, %s6000_s14 }
  0x46   : > { %p5997_p10 = pnand %p5995_p8, %p6276_p7  ;;  %p6003_p9 = scmp.lt.s32.totalorder %s6001_s15, %s5994_s26 }
  0x48   : > { %p5998_p11 = pneg %p5997_p10  ;;  %p6004_p13 = por %p6003_p9, %p6002_p0 }
  0x4a   : > { %p6005_p1 = pnand %p6004_p13, %p5998_p11 }
  0x4c   : > { %6008 = shalt.err (!%p6005_p1)
}
  0x4d   : > { %s6177_s16 = smov 64   ;;  %s6178_s23 = smov 4  }
  0x4e   : > { %5154 = dma.hbm_to_vmem [thread:$0]  (!%p6256_p5), %s6305_s17, 10240, %s6307_s24, %s6311_s28, %s6177_s16, %s6177_s16, %s6178_s23  }
  0x4f   : > { %s6336_s30 = sadd.s32 4294967295, %s6171_s21   ;;  %s4464_s8 = sadd.s32 4294967294, %s6171_s21  }
  0x50   : > { %p66_p12 = scmp.ne.s32.totalorder %s6163_s19, %s6159_s18  ;;  %p7187_p2 = scmp.eq.s32.totalorder %s6336_s30, 0 }
  0x51   : > { %p168_p3 = scmp.eq.s32.totalorder %s6336_s30, 6  ;;  %p174_p4 = scmp.eq.s32.totalorder %s4464_s8, 6 }
  0x52   : > { %p4465_p6 = scmp.ge.s32.totalorder %s6171_s21, 1  ;;  %p6346_p8 = por %p7187_p2, %p66_p12 }
  0x53   : > { %p7209_p10 = scmp.ne.s32.totalorder %s6167_s20, %s6163_s19  ;;  %p6357_p0 = por %p174_p4, %p66_p12 }
  0x54   : > { %s7208_s10 = scalar_select %p6346_p8, 1, 0 }
  0x55   : > { %p6353_p11 = por %p168_p3, %p7209_p10  ;;  %p181_p9 = scmp.lt.s32.totalorder %s6171_s21, 8 }
  0x56   : > { %s7211_s24 = scalar_select %p6357_p0, 1, 0 }
  0x57   : > { %s7210_s17 = scalar_select %p6353_p11, 1, 0 }
  0x58   : > { %7212 = sst [smem:[#allocation21_spill]] %s7211_s24  ;;  %p6362_p13 = pnand %p4465_p6, %p181_p9 }
  0x59   : > { %s6179_s7 = smov [#allocation2]   ;;  %s5120_s26 = smul.u32 10, %s6253_s27 }
  0x5a   : > { %s7213_s6 = scalar_select %p6362_p13, 1, 0 }
  0x5b   : > { %s193_s9 = sshll.u32 %s6179_s7, 4  ;;  %p5141_p1 = pneg %p6362_p13  ;;  %s6366_s9 = int_to_ptr.vmem [resolvable:$true] %s193_s9 }
  0x5c   : > { %s5121_s14 = smul.u32 160, %s6171_s21  ;;  %s4471_s15 = sshll.u32 %s6171_s21, 4 }
  0x5d   : > { %p6373_p3 = pnand %p5141_p1, %p7187_p2  ;;  %s6009_s3 = scalar_lea.hbm %s7176_s0, 1024 }
  0x5e   : > { %s6382_s8 = scalar_lea.hbm %s7178_s2, %s5121_s14  ;;  %p6010_p12 = scmp.ne.s32.totalorder %s7176_s0, %s6009_s3 }
  0x5f   : > { %p6011_p4 = pneg %p6373_p3  ;;  %p6016_p9 = scmp.lt.u32.totalorder %s6009_s3, %s7176_s0 }
  0x61   : > { %p6012_p6 = pnand %p6011_p4, %p6010_p12 }
  0x63   : > { %p6013_p10 = pneg %p6012_p6 }
  0x65   : > { %p6018_p1 = pnand %p6016_p9, %p6013_p10 }
  0x67   : > { %6021 = shalt.err (!%p6018_p1)
}
  0x68   : > { %s6022_s14 = scalar_lea.vmem %s6366_s9, 1024  ;;  %p6030_p8 = scmp.lt.s32.totalorder %s6366_s9, %s6366_s9 }
  0x69   : > { %p6023_p2 = scmp.ne.s32.totalorder %s6366_s9, %s6022_s14  ;;  %p6031_p13 = scmp.lt.s32.totalorder %s6022_s14, %s6022_s14 }
  0x6b   : > { %p6025_p0 = pnand %p6023_p2, %p6011_p4  ;;  %p6032_p5 = por %p6031_p13, %p6030_p8 }
  0x6d   : > { %p6026_p11 = pneg %p6025_p0 }
  0x6f   : > { %p6033_p7 = pnand %p6032_p5, %p6026_p11 }
  0x71   : > { %6036 = shalt.err (!%p6033_p7)
}
  0x72   : > { %s6180_s1 = smov 256   ;;  %s6181_s3 = smov 16  }
  0x73   : > { %5144 = dma.hbm_to_vmem [thread:$0]  (!%p6373_p3), %s7176_s0, 1024, %s6366_s9, [#allocation3], %s6180_s1, %s6180_s1, %s6181_s3  }
  0x74   : > { %s232_s25 = scalar_lea.vmem [#allocation7], %s5120_s26  ;;  %s6408_s7 = scalar_lea.hbm %s7180_s4, %s4471_s15 }
  0x75   : > { %s240_s24 = sshll.u32 %s232_s25, 4  ;;  %s271_s14 = scalar_lea.vmem [#allocation10], %s6253_s27  ;;  %s6410_s24 = int_to_ptr.vmem [resolvable:$true] %s240_s24 }
  0x76   : > { %s278_s18 = sshll.u32 %s271_s14, 4  ;;  %s6037_s21 = scalar_lea.hbm %s6382_s8, 160  ;;  %s279_s18 = int_to_ptr.vmem [resolvable:$true] %s278_s18 }
  0x77   : > { %p6038_p5 = scmp.ne.s32.totalorder %s6382_s8, %s6037_s21  ;;  %p7215_p7 = scmp.ne.s32.totalorder %s7206_s13, 0 }
  0x78   : > { %s6042_s9 = scalar_lea.hbm %s7178_s2, 1120  ;;  %p6043_p11 = scmp.lt.u32.totalorder %s6382_s8, %s7178_s2 }
  0x79   : > { %p6040_p2 = pnand %p6038_p5, %p7215_p7  ;;  %p6044_p0 = scmp.lt.u32.totalorder %s6042_s9, %s6037_s21 }
  0x7a   : > { %p6046_p3 = scmp.lt.u32.totalorder %s6037_s21, %s6382_s8 }
  0x7b   : > { %p6041_p8 = pneg %p6040_p2  ;;  %p6045_p13 = por %p6044_p0, %p6043_p11 }
  0x7d   : > { %p6047_p12 = por %p6046_p3, %p6045_p13 }
  0x7f   : > { %p6048_p4 = pnand %p6047_p12, %p6041_p8 }
  0x81   : > { %6051 = shalt.err (!%p6048_p4)
}
  0x82   : > { %s6052_s27 = scalar_lea.vmem %s6410_s24, 160  ;;  %s6182_s15 = smov [#allocation7]  }
  0x83   : > { %p6053_p6 = scmp.ne.s32.totalorder %s6410_s24, %s6052_s27  ;;  %s6057_s3 = sshll.u32 %s6182_s15, 4  ;;  %s6058_s3 = int_to_ptr.vmem [resolvable:$false] %s6057_s3 }
  0x84   : > { %s6059_s22 = scalar_lea.vmem %s6058_s3, 320  ;;  %p6060_p1 = scmp.lt.s32.totalorder %s6410_s24, %s6058_s3 }
  0x85   : > { %p6055_p10 = pnand %p6053_p6, %p7215_p7  ;;  %p6061_p5 = scmp.lt.s32.totalorder %s6059_s22, %s6052_s27 }
  0x87   : > { %p6056_p9 = pneg %p6055_p10  ;;  %p6062_p2 = por %p6061_p5, %p6060_p1 }
  0x89   : > { %p6063_p11 = pnand %p6062_p2, %p6056_p9 }
  0x8b   : > { %6066 = shalt.err (!%p6063_p11)
}
  0x8c   : > { %p7216_p8 = scmp.ne.s32.totalorder %s7204_s29, 0  ;;  %s6067_s21 = scalar_lea.hbm %s6408_s7, 16 }
  0x8d   : > { %p6068_p0 = scmp.ne.s32.totalorder %s6408_s7, %s6067_s21  ;;  %s6072_s23 = scalar_lea.hbm %s7180_s4, 112 }
  0x8e   : > { %5151 = dma.hbm_to_vmem [thread:$0]  (!%p7216_p8), %s6382_s8, 160, %s6410_s24, %s6270_s11  }
  0x8f   : > { %p6070_p13 = pnand %p6068_p0, %p7215_p7  ;;  %p6073_p12 = scmp.lt.u32.totalorder %s6408_s7, %s7180_s4 }
  0x90   : > { %p6074_p4 = scmp.lt.u32.totalorder %s6072_s23, %s6067_s21  ;;  %p6076_p10 = scmp.lt.u32.totalorder %s6067_s21, %s6408_s7 }
  0x91   : > { %p6071_p3 = pneg %p6070_p13 }
  0x92   : > { %p6075_p6 = por %p6074_p4, %p6073_p12 }
  0x94   : > { %p6077_p9 = por %p6076_p10, %p6075_p6 }
  0x96   : > { %p6078_p1 = pnand %p6077_p9, %p6071_p3 }
  0x98   : > { %6081 = shalt.err (!%p6078_p1)
}
  0x99   : > { %s6082_s11 = scalar_lea.vmem %s279_s18, 16  ;;  %s6183_s8 = smov [#allocation10]  }
  0x9a   : > { %p6083_p5 = scmp.ne.s32.totalorder %s279_s18, %s6082_s11  ;;  %s6087_s24 = sshll.u32 %s6183_s8, 4  ;;  %s6088_s24 = int_to_ptr.vmem [resolvable:$false] %s6087_s24 }
  0x9b   : > { %s6089_s20 = scalar_lea.vmem %s6088_s24, 32  ;;  %p6090_p0 = scmp.lt.s32.totalorder %s279_s18, %s6088_s24 }
  0x9c   : > { %p6085_p2 = pnand %p6083_p5, %p7215_p7  ;;  %p6091_p13 = scmp.lt.s32.totalorder %s6089_s20, %s6082_s11 }
  0x9e   : > { %p6086_p11 = pneg %p6085_p2  ;;  %p6092_p8 = por %p6091_p13, %p6090_p0 }
  0xa0   : > { %p6093_p4 = pnand %p6092_p8, %p6086_p11 }
  0xa2   : > { %6096 = shalt.err (!%p6093_p4)
}
  0xa3   : > { %p7217_p12 = scmp.ne.s32.totalorder %s7204_s29, 0  ;;  %p7218_p3 = scmp.ne.s32.totalorder %s7213_s6, 0 }
  0xa4   : > { %p7219_p7 = scmp.eq.s32.totalorder (!%p7218_p3), %s6336_s30, 0 }
  0xa5   : > { %5157 = dma.hbm_to_vmem [thread:$0]  (!%p7217_p12), %s6408_s7, 16, %s279_s18, %s6311_s28  }
  0xa6   : > { %287 = sbr.rel (%p7218_p3) target bundleno = 1391 (0x56f), region = 40 }
  0xad   : > { %6142 = dma.done.wait (%p7219_p7), [#allocation3], 1024   ;;  %p7220_p6 = pmov %p7219_p7 }
  0xae   : > { %s293_s13 = sand.u32 1, %s6336_s30   ;;  %s6461_s9 = sand.u32 1, %s6163_s19  }
  0xaf   : > { %6144 = vsyncadd (%p7220_p6), [#allocation3], 4294966272  ;;  %s5124_s29 = smul.u32 2560, %s6461_s9  ;;  %s294_s26 = scalar_lea.sflag [#allocation6], %s293_s13 }
  0xb0   : > { %p7221_p8 = scmp.ne.s32.totalorder %s7208_s10, 0 }
  0xb1   : > { %s6464_s1 = scalar_lea.vmem [#allocation5], %s5124_s29 }
  0xb2   : > { %6146 = dma.done.wait (%p7221_p8), %s294_s26, 41120  }
  0xb3   : > { %6148 = vsyncadd (%p7221_p8), %s294_s26, 4294926176  ;;  %s5125_s18 = smul.u32 10, %s6461_s9  ;;  %s312_s7 = scalar_lea.sflag [#allocation9], %s293_s13 }
  0xb4   : > { %s5126_s28 = smul.u32 640, %s6461_s9 }
  0xb5   : > { %s6472_s6 = scalar_lea.vmem [#allocation7], %s5125_s18 }
  0xb6   : > { %s6474_s27 = scalar_lea.vmem [#allocation8], %s5126_s28 }
  0xb7   : > { %6150 = dma.done.wait (%p7221_p8), %s312_s7, 10256  }
  0xb8   : > { %6152 = vsyncadd (%p7221_p8), %s312_s7, 4294957040  ;;  %v5205_v0 = vld [vmem:[%s6464_s1 + $0x4] ss:$40 sps:$4 sm:$0xff]   ;;  %v5207_v1 = vld [vmem:[%s6464_s1] ss:$40 sps:$4 sm:$0xff]   ;;  %vm3584_vm0 = vcmask 1041409  }
  0xb9   : > { %2387 = vmatprep.subr.bf16.mxu0 %v5205_v0  ;;  %v5208_v2 = vld [vmem:[%s6464_s1 + $0x54] ss:$40 sps:$4 sm:$0xff]   ;;  %v5210_v3 = vld [vmem:[%s6464_s1 + $0x50] ss:$40 sps:$4 sm:$0xff]   ;;  %v5211_v4 = vld [vmem:[%s6464_s1 + $0xa4] ss:$40 sps:$4 sm:$0xff]  }
  0xba   : > { %2388 = vmatpush1.bf16.msra.mxu0 %v5207_v1  ;;  %v5213_v5 = vld [vmem:[%s6464_s1 + $0xa0] ss:$40 sps:$4 sm:$0xff]   ;;  %v5214_v6 = vld [vmem:[%s6464_s1 + $0xf4] ss:$40 sps:$4 sm:$0xff]   ;;  %v5216_v9 = vld [vmem:[%s6464_s1 + $0xf0] ss:$40 sps:$4 sm:$0xff]  }
  0xbb   : > { %2389 = vmatprep.subr.bf16.mxu0 %v5208_v2  ;;  %v5222_v7 = vld [vmem:[%s6464_s1 + $0xc] ss:$40 sps:$4 sm:$0xff]   ;;  %v5225_v8 = vld [vmem:[%s6464_s1 + $0x8] ss:$40 sps:$4 sm:$0xff]   ;;  %v5228_v10 = vld [vmem:[%s6464_s1 + $0x5c] ss:$40 sps:$4 sm:$0xff]  }
  0xbc   : > { %2493 = vmatprep.subr.bf16.mxu1 %v5222_v7  ;;  %v5231_v11 = vld [vmem:[%s6464_s1 + $0x58] ss:$40 sps:$4 sm:$0xff]   ;;  %v5217_v12 = vld [vmem:[%s6464_s1 + $0x144] ss:$40 sps:$4 sm:$0xff]   ;;  %v5237_v15 = vld [vmem:[%s6464_s1 + $0xa8] ss:$40 sps:$4 sm:$0xff]  }
  0xbd   : > { %2494 = vmatpush1.bf16.msra.mxu1 %v5225_v8  ;;  %v5234_v13 = vld [vmem:[%s6464_s1 + $0xac] ss:$40 sps:$4 sm:$0xff]   ;;  %v5219_v14 = vld [vmem:[%s6464_s1 + $0x140] ss:$40 sps:$4 sm:$0xff]   ;;  %v5240_v17 = vld [vmem:[%s6464_s1 + $0xfc] ss:$40 sps:$4 sm:$0xff]  }
  0xbe   : > { %2390 = vmatpush1.bf16.msra.mxu0 %v5210_v3  ;;  %2495 = vmatprep.subr.bf16.mxu1 %v5228_v10  ;;  %v5220_v16 = vld [vmem:[%s6464_s1 + $0x194] ss:$40 sps:$4 sm:$0xff]   ;;  %v5224_v18 = vld [vmem:[%s6464_s1 + $0x190] ss:$40 sps:$4 sm:$0xff]   ;;  %v5226_v19 = vld [vmem:[%s6464_s1 + $0x1e4] ss:$40 sps:$4 sm:$0xff]  }
  0xbf   : > { %2391 = vmatprep.subr.bf16.mxu0 %v5211_v4  ;;  %v5243_v20 = vld [vmem:[%s6464_s1 + $0xf8] ss:$40 sps:$4 sm:$0xff]   ;;  %v5246_v21 = vld [vmem:[%s6464_s1 + $0x14c] ss:$40 sps:$4 sm:$0xff]   ;;  %v5249_v23 = vld [vmem:[%s6464_s1 + $0x148] ss:$40 sps:$4 sm:$0xff]  }
  0xc0   : > { %v5230_v22 = vld [vmem:[%s6464_s1 + $0x1e0] ss:$40 sps:$4 sm:$0xff]   ;;  %v5232_v24 = vld [vmem:[%s6464_s1 + $0x234] ss:$40 sps:$4 sm:$0xff]   ;;  %v5236_v26 = vld [vmem:[%s6464_s1 + $0x230] ss:$40 sps:$4 sm:$0xff]  }
  0xc1   : > { %2496 = vmatpush1.bf16.msra.mxu1 %v5231_v11  ;;  %v5252_v25 = vld [vmem:[%s6464_s1 + $0x19c] ss:$40 sps:$4 sm:$0xff]   ;;  %v5255_v28 = vld [vmem:[%s6464_s1 + $0x198] ss:$40 sps:$4 sm:$0xff]   ;;  %v5258_v29 = vld [vmem:[%s6464_s1 + $0x1ec] ss:$40 sps:$4 sm:$0xff]  }
  0xc2   : > { %2392 = vmatpush1.bf16.msra.mxu0 %v5213_v5  ;;  %2497 = vmatprep.subr.bf16.mxu1 %v5234_v13  ;;  %v5238_v27 = vld [vmem:[%s6464_s1 + $0x284] ss:$40 sps:$4 sm:$0xff]   ;;  %v5242_v30 = vld [vmem:[%s6464_s1 + $0x280] ss:$40 sps:$4 sm:$0xff]   ;;  %v5244_v32 = vld [vmem:[%s6464_s1 + $0x2d4] ss:$40 sps:$4 sm:$0xff]  }
  0xc3   : > { %2393 = vmatprep.subr.bf16.mxu0 %v5214_v6  ;;  %v5261_v31 = vld [vmem:[%s6464_s1 + $0x1e8] ss:$40 sps:$4 sm:$0xff]   ;;  %v5264_v33 = vld [vmem:[%s6464_s1 + $0x23c] ss:$40 sps:$4 sm:$0xff]   ;;  %v5267_v36 = vld [vmem:[%s6464_s1 + $0x238] ss:$40 sps:$4 sm:$0xff]  }
  0xc4   : > { %v5248_v34 = vld [vmem:[%s6464_s1 + $0x2d0] ss:$40 sps:$4 sm:$0xff]   ;;  %v5250_v35 = vld [vmem:[%s6464_s1 + $0x324] ss:$40 sps:$4 sm:$0xff]   ;;  %v5254_v39 = vld [vmem:[%s6464_s1 + $0x320] ss:$40 sps:$4 sm:$0xff]  }
  0xc5   : > { %2498 = vmatpush1.bf16.msra.mxu1 %v5237_v15  ;;  %v5270_v37 = vld [vmem:[%s6464_s1 + $0x28c] ss:$40 sps:$4 sm:$0xff]   ;;  %v5273_v41 = vld [vmem:[%s6464_s1 + $0x288] ss:$40 sps:$4 sm:$0xff]   ;;  %v5276_v42 = vld [vmem:[%s6464_s1 + $0x2dc] ss:$40 sps:$4 sm:$0xff]  }
  0xc6   : > { %2394 = vmatpush1.bf16.msra.mxu0 %v5216_v9  ;;  %2499 = vmatprep.subr.bf16.mxu1 %v5240_v17  ;;  %v6518_v38 = vld [vmem:[#allocation2 + $0x4] ss:$16 sps:$4 sm:$0xff]   ;;  %v5260_v43 = vld [vmem:[%s6464_s1 + $0x370] ss:$40 sps:$4 sm:$0xff]   ;;  %v5266_v47 = vld [vmem:[%s6464_s1 + $0x3c0] ss:$40 sps:$4 sm:$0xff]  }
  0xc7   : > { %2395 = vmatprep.subr.bf16.mxu0 %v5217_v12  ;;  %2419 = vmatprep.mubr.bf16.mxu0 %v6518_v38  ;;  %v5256_v40 = vld [vmem:[%s6464_s1 + $0x374] ss:$40 sps:$4 sm:$0xff]   ;;  %v5262_v44 = vld [vmem:[%s6464_s1 + $0x3c4] ss:$40 sps:$4 sm:$0xff]   ;;  %v5279_v45 = vld [vmem:[%s6464_s1 + $0x2d8] ss:$40 sps:$4 sm:$0xff]  }
  0xc8   : > { %2525 = vmatprep.mubr.bf16.mxu1 %v6518_v38  ;;  %v5282_v46 = vld [vmem:[%s6464_s1 + $0x32c] ss:$40 sps:$4 sm:$0xff]   ;;  %v5285_v49 = vld [vmem:[%s6464_s1 + $0x328] ss:$40 sps:$4 sm:$0xff]   ;;  %v5291_v50 = vld [vmem:[%s6464_s1 + $0x37c] ss:$40 sps:$4 sm:$0xff]  }
  0xc9   : > { %2500 = vmatpush1.bf16.msra.mxu1 %v5243_v20  ;;  %v5268_v48 = vld [vmem:[%s6464_s1 + $0x414] ss:$40 sps:$4 sm:$0xff]   ;;  %v5272_v51 = vld [vmem:[%s6464_s1 + $0x410] ss:$40 sps:$4 sm:$0xff]   ;;  %v5274_v52 = vld [vmem:[%s6464_s1 + $0x464] ss:$40 sps:$4 sm:$0xff]  }
  0xca   : > { %2396 = vmatpush1.bf16.msra.mxu0 %v5219_v14  ;;  %2501 = vmatprep.subr.bf16.mxu1 %v5246_v21  ;;  %v5294_v53 = vld [vmem:[%s6464_s1 + $0x378] ss:$40 sps:$4 sm:$0xff]   ;;  %v5298_v54 = vld [vmem:[%s6464_s1 + $0x3cc] ss:$40 sps:$4 sm:$0xff]   ;;  %v5300_v57 = vld [vmem:[%s6464_s1 + $0x3c8] ss:$40 sps:$4 sm:$0xff]  }
  0xcb   : > { %2397 = vmatprep.subr.bf16.mxu0 %v5220_v16  ;;  %v5278_v55 = vld [vmem:[%s6464_s1 + $0x460] ss:$40 sps:$4 sm:$0xff]   ;;  %v5280_v56 = vld [vmem:[%s6464_s1 + $0x4b4] ss:$40 sps:$4 sm:$0xff]   ;;  %v5284_v59 = vld [vmem:[%s6464_s1 + $0x4b0] ss:$40 sps:$4 sm:$0xff]  }
  0xcc   : > { %v5304_v58 = vld [vmem:[%s6464_s1 + $0x41c] ss:$40 sps:$4 sm:$0xff]   ;;  %v5306_v61 = vld [vmem:[%s6464_s1 + $0x418] ss:$40 sps:$4 sm:$0xff]   ;;  %v5310_v62 = vld [vmem:[%s6464_s1 + $0x46c] ss:$40 sps:$4 sm:$0xff]  }
  0xcd   : > { %2502 = vmatpush1.bf16.msra.mxu1 %v5249_v23  ;;  %v5290_v60 = vld [vmem:[%s6464_s1 + $0x504] ss:$40 sps:$4 sm:$0xff]   ;;  %v5288_v63 = vld [vmem:[%s6464_s1 + $0x500] ss:$40 sps:$4 sm:$0xff]   ;;  %v5297_v1 = vld [vmem:[%s6464_s1 + $0x554] ss:$40 sps:$4 sm:$0xff]  }
  0xce   : > { %2398 = vmatpush1.bf16.msra.mxu0 %v5224_v18  ;;  %2503 = vmatprep.subr.bf16.mxu1 %v5252_v25  ;;  %v6547_v0 = vld [vmem:[#allocation2] ss:$16 sps:$4 sm:$0xff]   ;;  %v5316_v3 = vld [vmem:[%s6464_s1 + $0x4bc] ss:$40 sps:$4 sm:$0xff]   ;;  %v5324_v7 = vld [vmem:[%s6464_s1 + $0x50c] ss:$40 sps:$4 sm:$0xff]  }
  0xcf   : > { %2399 = vmatprep.subr.bf16.mxu0 %v5226_v19  ;;  %v5312_v2 = vld [vmem:[%s6464_s1 + $0x468] ss:$40 sps:$4 sm:$0xff]   ;;  %v5303_v5 = vld [vmem:[%s6464_s1 + $0x5a4] ss:$40 sps:$4 sm:$0xff]   ;;  %v5318_v6 = vld [vmem:[%s6464_s1 + $0x4b8] ss:$40 sps:$4 sm:$0xff]  }
  0xd0   : > { %v5295_v4 = vld [vmem:[%s6464_s1 + $0x550] ss:$40 sps:$4 sm:$0xff]   ;;  %v5301_v8 = vld [vmem:[%s6464_s1 + $0x5a0] ss:$40 sps:$4 sm:$0xff]   ;;  %v5309_v9 = vld [vmem:[%s6464_s1 + $0x5f4] ss:$40 sps:$4 sm:$0xff]  }
  0xd1   : > { %2504 = vmatpush1.bf16.msra.mxu1 %v5255_v28  ;;  %v5322_v10 = vld [vmem:[%s6464_s1 + $0x508] ss:$40 sps:$4 sm:$0xff]   ;;  %v5330_v11 = vld [vmem:[%s6464_s1 + $0x55c] ss:$40 sps:$4 sm:$0xff]   ;;  %v5328_v14 = vld [vmem:[%s6464_s1 + $0x558] ss:$40 sps:$4 sm:$0xff]  }
  0xd2   : > { %2400 = vmatpush1.bf16.msra.mxu0 %v5230_v22  ;;  %2505 = vmatprep.subr.bf16.mxu1 %v5258_v29  ;;  %v5307_v12 = vld [vmem:[%s6464_s1 + $0x5f0] ss:$40 sps:$4 sm:$0xff]   ;;  %v5315_v13 = vld [vmem:[%s6464_s1 + $0x644] ss:$40 sps:$4 sm:$0xff]   ;;  %v5313_v18 = vld [vmem:[%s6464_s1 + $0x640] ss:$40 sps:$4 sm:$0xff]  }
  0xd3   : > { %2401 = vmatprep.subr.bf16.mxu0 %v5232_v24  ;;  %v6565_v15 = vld [vmem:[#allocation2 + $0x24] ss:$16 sps:$4 sm:$0xff]   ;;  %v6567_v16 = vld [vmem:[#allocation2 + $0x20] ss:$16 sps:$4 sm:$0xff]   ;;  %v6578_v23 = vld [vmem:[#allocation2 + $0xc] ss:$16 sps:$4 sm:$0xff]  }
  0xd4   : > { %v5336_v17 = vld [vmem:[%s6464_s1 + $0x5ac] ss:$40 sps:$4 sm:$0xff]   ;;  %v5334_v20 = vld [vmem:[%s6464_s1 + $0x5a8] ss:$40 sps:$4 sm:$0xff]   ;;  %v5342_v21 = vld [vmem:[%s6464_s1 + $0x5fc] ss:$40 sps:$4 sm:$0xff]  }
  0xd5   : > { %2506 = vmatpush1.bf16.msra.mxu1 %v5261_v31  ;;  %v5321_v19 = vld [vmem:[%s6464_s1 + $0x694] ss:$40 sps:$4 sm:$0xff]   ;;  %v5319_v22 = vld [vmem:[%s6464_s1 + $0x690] ss:$40 sps:$4 sm:$0xff]   ;;  %v5327_v24 = vld [vmem:[%s6464_s1 + $0x6e4] ss:$40 sps:$4 sm:$0xff]  }
  0xd6   : > { %2402 = vmatpush1.bf16.msra.mxu0 %v5236_v26  ;;  %2507 = vmatprep.subr.bf16.mxu1 %v5264_v33  ;;  %v5340_v25 = vld [vmem:[%s6464_s1 + $0x5f8] ss:$40 sps:$4 sm:$0xff]   ;;  %v5348_v26 = vld [vmem:[%s6464_s1 + $0x64c] ss:$40 sps:$4 sm:$0xff]   ;;  %v5346_v29 = vld [vmem:[%s6464_s1 + $0x648] ss:$40 sps:$4 sm:$0xff]  }
  0xd7   : > { %2403 = vmatprep.subr.bf16.mxu0 %v5238_v27  ;;  %v5325_v27 = vld [vmem:[%s6464_s1 + $0x6e0] ss:$40 sps:$4 sm:$0xff]   ;;  %v5333_v28 = vld [vmem:[%s6464_s1 + $0x734] ss:$40 sps:$4 sm:$0xff]   ;;  %v5331_v31 = vld [vmem:[%s6464_s1 + $0x730] ss:$40 sps:$4 sm:$0xff]  }
  0xd8   : > { %v5352_v33 = vld [vmem:[%s6464_s1 + $0x698] ss:$40 sps:$4 sm:$0xff]   ;;  %s323_s10 = scalar_lea.vmem [#allocation10], %s6461_s9  ;;  %vm4295_vm1 = vcmask 1041408   ;;  %s4474_s15 = sshll.u32 %s6461_s9, 1 }
  0xd9   : > { %2508 = vmatpush1.bf16.msra.mxu1 %v5267_v36  ;;  %v5345_v36 = vld [vmem:[%s6464_s1 + $0x7d4] ss:$40 sps:$4 sm:$0xff]   ;;  %s4925_s3 = sshll.u32 %s6336_s30, 5  ;;  %s363_s22 = scalar_lea.vmem [#allocation11], %s4474_s15 }
  0xda   : > { %2404 = vmatpush1.bf16.msra.mxu0 %v5242_v30  ;;  %2509 = vmatprep.subr.bf16.mxu1 %v5270_v37  ;;  %v5354_v30 = vld [vmem:[%s6464_s1 + $0x69c] ss:$40 sps:$4 sm:$0xff]   ;;  %v5358_v37 = vld [vmem:[%s6464_s1 + $0x6e8] ss:$40 sps:$4 sm:$0xff]   ;;  %s4322_s21 = sshll.u32 %s363_s22, 4  ;;  %s7133_s23 = scalar_lea.hbm %s7181_s5, %s4925_s3  ;;  %s7135_s21 = int_to_ptr.vmem [resolvable:$true] %s4322_s21 }
  0xdb   : > { %2405 = vmatprep.subr.bf16.mxu0 %v5244_v32  ;;  %v5339_v32 = vld [vmem:[%s6464_s1 + $0x784] ss:$40 sps:$4 sm:$0xff]   ;;  %s4309_s14 = scalar_lea.sflag [#allocation4], %s6461_s9  ;;  %s6097_s12 = scalar_lea.vmem %s7135_s21, 32 }
  0xdc   : > { %p6098_p10 = scmp.ne.s32.totalorder %s7135_s21, %s6097_s12  ;;  %p7222_p9 = scmp.ne.s32.totalorder %s7210_s17, 0 }
  0xdd   : > { %2510 = vmatpush1.bf16.msra.mxu1 %v5273_v41  ;;  %v5351_v41 = vld [vmem:[%s6464_s1 + $0x824] ss:$40 sps:$4 sm:$0xff]   ;;  %s6184_s30 = smov [#allocation11]  }
  0xde   : > { %2406 = vmatpush1.bf16.msra.mxu0 %v5248_v34  ;;  %2511 = vmatprep.subr.bf16.mxu1 %v5276_v42  ;;  %v5360_v34 = vld [vmem:[%s6464_s1 + $0x6ec] ss:$40 sps:$4 sm:$0xff]   ;;  %v5364_v42 = vld [vmem:[%s6464_s1 + $0x738] ss:$40 sps:$4 sm:$0xff]   ;;  %p6099_p1 = pnand %p6098_p10, %p7222_p9  ;;  %s6101_s11 = sshll.u32 %s6184_s30, 4  ;;  %s6102_s11 = int_to_ptr.vmem [resolvable:$false] %s6101_s11 }
  0xdf   : > { %2407 = vmatprep.subr.bf16.mxu0 %v5250_v35  ;;  %v5337_v35 = vld [vmem:[%s6464_s1 + $0x780] ss:$40 sps:$4 sm:$0xff]   ;;  %s6103_s8 = scalar_lea.vmem %s6102_s11, 64  ;;  %p6104_p2 = scmp.lt.s32.totalorder %s7135_s21, %s6102_s11 }
  0xe0   : > { %p6100_p5 = pneg %p6099_p1  ;;  %p6105_p11 = scmp.lt.s32.totalorder %s6103_s8, %s6097_s12 }
  0xe1   : > { %2512 = vmatpush1.bf16.msra.mxu1 %v5279_v45  ;;  %v5357_v45 = vld [vmem:[%s6464_s1 + $0x874] ss:$40 sps:$4 sm:$0xff]  }
  0xe2   : > { %2408 = vmatpush1.bf16.msra.mxu0 %v5254_v39  ;;  %2513 = vmatprep.subr.bf16.mxu1 %v5282_v46  ;;  %v5366_v39 = vld [vmem:[%s6464_s1 + $0x73c] ss:$40 sps:$4 sm:$0xff]   ;;  %v5370_v46 = vld [vmem:[%s6464_s1 + $0x788] ss:$40 sps:$4 sm:$0xff]   ;;  %p6106_p0 = por %p6105_p11, %p6104_p2 }
  0xe3   : > { %2409 = vmatprep.subr.bf16.mxu0 %v5256_v40  ;;  %v5343_v40 = vld [vmem:[%s6464_s1 + $0x7d0] ss:$40 sps:$4 sm:$0xff]  }
  0xe4   : > { %p6107_p13 = pnand %p6106_p0, %p6100_p5 }
  0xe5   : > { %2514 = vmatpush1.bf16.msra.mxu1 %v5285_v49  ;;  %v5363_v49 = vld [vmem:[%s6464_s1 + $0x8c4] ss:$40 sps:$4 sm:$0xff]  }
  0xe6   : > { %2410 = vmatpush1.bf16.msra.mxu0 %v5260_v43  ;;  %2515 = vmatprep.subr.bf16.mxu1 %v5291_v50  ;;  %v5372_v43 = vld [vmem:[%s6464_s1 + $0x78c] ss:$40 sps:$4 sm:$0xff]   ;;  %v5379_v50 = vld [vmem:[%s6464_s1 + $0x7d8] ss:$40 sps:$4 sm:$0xff]  }
  0xe7   : > { %2411 = vmatprep.subr.bf16.mxu0 %v5262_v44  ;;  %v5349_v44 = vld [vmem:[%s6464_s1 + $0x820] ss:$40 sps:$4 sm:$0xff]  }
  0xe9   : > { %2516 = vmatpush1.bf16.msra.mxu1 %v5294_v53  ;;  %v5369_v53 = vld [vmem:[%s6464_s1 + $0x914] ss:$40 sps:$4 sm:$0xff]  }
  0xea   : > { %2412 = vmatpush1.bf16.msra.mxu0 %v5266_v47  ;;  %2517 = vmatprep.subr.bf16.mxu1 %v5298_v54  ;;  %v5381_v47 = vld [vmem:[%s6464_s1 + $0x7dc] ss:$40 sps:$4 sm:$0xff]   ;;  %v5385_v54 = vld [vmem:[%s6464_s1 + $0x828] ss:$40 sps:$4 sm:$0xff]  }
  0xeb   : > { %2413 = vmatprep.subr.bf16.mxu0 %v5268_v48  ;;  %v5355_v48 = vld [vmem:[%s6464_s1 + $0x870] ss:$40 sps:$4 sm:$0xff]  }
  0xed   : > { %2518 = vmatpush1.bf16.msra.mxu1 %v5300_v57  ;;  %v5378_v57 = vld [vmem:[%s6464_s1 + $0x964] ss:$40 sps:$4 sm:$0xff]  }
  0xee   : > { %2414 = vmatpush1.bf16.msra.mxu0 %v5272_v51  ;;  %2519 = vmatprep.subr.bf16.mxu1 %v5304_v58  ;;  %v5387_v51 = vld [vmem:[%s6464_s1 + $0x82c] ss:$40 sps:$4 sm:$0xff]   ;;  %v5391_v58 = vld [vmem:[%s6464_s1 + $0x878] ss:$40 sps:$4 sm:$0xff]  }
  0xef   : > { %2415 = vmatprep.subr.bf16.mxu0 %v5274_v52  ;;  %v5361_v52 = vld [vmem:[%s6464_s1 + $0x8c0] ss:$40 sps:$4 sm:$0xff]  }
  0xf1   : > { %2520 = vmatpush1.bf16.msra.mxu1 %v5306_v61  ;;  %v5384_v61 = vld [vmem:[%s6464_s1 + $0x9b4] ss:$40 sps:$4 sm:$0xff]  }
  0xf2   : > { %2416 = vmatpush1.bf16.msra.mxu0 %v5278_v55  ;;  %2521 = vmatprep.subr.bf16.mxu1 %v5310_v62  ;;  %v5393_v55 = vld [vmem:[%s6464_s1 + $0x87c] ss:$40 sps:$4 sm:$0xff]   ;;  %v5397_v62 = vld [vmem:[%s6464_s1 + $0x8c8] ss:$40 sps:$4 sm:$0xff]  }
  0xf3   : > { %2417 = vmatprep.subr.bf16.mxu0 %v5280_v56  ;;  %v5367_v56 = vld [vmem:[%s6464_s1 + $0x910] ss:$40 sps:$4 sm:$0xff]  }
  0xf5   : > { %2522 = vmatpush1.bf16.msra.mxu1 %v5312_v2  ;;  %v5396_v2 = vld [vmem:[%s6464_s1 + $0x14] ss:$40 sps:$4 sm:$0xff]  }
  0xf6   : > { %2418 = vmatpush1.bf16.msra.mxu0 %v5284_v59  ;;  %2523 = vmatprep.subr.bf16.mxu1 %v5316_v3  ;;  %v5399_v59 = vld [vmem:[%s6464_s1 + $0x8cc] ss:$40 sps:$4 sm:$0xff]   ;;  %v5406_v3 = vld [vmem:[%s6464_s1 + $0x918] ss:$40 sps:$4 sm:$0xff]  }
  0xf7   : > { %2440 = vmatprep.subr.bf16.mxu0 %v5290_v60  ;;  %v5376_v60 = vld [vmem:[%s6464_s1 + $0x960] ss:$40 sps:$4 sm:$0xff]  }
  0xf9   : > { %2420 = vmatmul.mubr.bf16.vlgmr.msra.gmra.mrb[0].mxu0 %v6547_v0  ;;  %2524 = vmatpush1.bf16.msra.mxu1 %v5318_v6  ;;  %v5394_v6 = vld [vmem:[%s6464_s1 + $0x10] ss:$40 sps:$4 sm:$0xff]  }
  0xfa   : > { %2441 = vmatpush1.bf16.msra.mxu0 %v5288_v63  ;;  %2546 = vmatprep.subr.bf16.mxu1 %v5324_v7  ;;  %v5408_v63 = vld [vmem:[%s6464_s1 + $0x91c] ss:$40 sps:$4 sm:$0xff]  }
  0xfb   : > { %2442 = vmatprep.subr.bf16.mxu0 %v5297_v1  ;;  %2429 = vmatprep.mubr.bf16.mxu0 %v6565_v15  ;;  %v5382_v1 = vld [vmem:[%s6464_s1 + $0x9b0] ss:$40 sps:$4 sm:$0xff]   ;;  %v5402_v7 = vld [vmem:[%s6464_s1 + $0x64] ss:$40 sps:$4 sm:$0xff]  }
  0xfc   : > { %2526 = vmatmul.mubr.bf16.vlgmr.msra.gmra.mrb[0].mxu1 %v6547_v0 }
  0xfd   : > { %2547 = vmatpush1.bf16.msra.mxu1 %v5322_v10  ;;  %2535 = vmatprep.mubr.bf16.mxu1 %v6565_v15  ;;  %v5420_v10 = vld [vmem:[%s6464_s1 + $0x9bc] ss:$40 sps:$4 sm:$0xff]  }
  0xfe   : > { %2443 = vmatpush1.bf16.msra.mxu0 %v5295_v4  ;;  %2548 = vmatprep.subr.bf16.mxu1 %v5330_v11  ;;  %v5414_v4 = vld [vmem:[%s6464_s1 + $0x96c] ss:$40 sps:$4 sm:$0xff]   ;;  %v5400_v11 = vld [vmem:[%s6464_s1 + $0x60] ss:$40 sps:$4 sm:$0xff]  }
  0xff   : > { %2444 = vmatprep.subr.bf16.mxu0 %v5303_v5  ;;  %v5390_v5 = vld [vmem:[#allocation2 + $0x8] ss:$16 sps:$4 sm:$0xff]  }
 0x101   : > { %2430 = vmatmul.mubr.bf16.gmra.mrb[4].mxu0 %v6567_v16  ;;  %2549 = vmatpush1.bf16.msra.mxu1 %v5328_v14  ;;  %v5429_v14 = vld [vmem:[%s6464_s1 + $0x1c] ss:$40 sps:$4 sm:$0xff]  }
 0x102   : > { %2445 = vmatpush1.bf16.msra.mxu0 %v5301_v8  ;;  %2550 = vmatprep.subr.bf16.mxu1 %v5336_v17  ;;  %v5403_v8 = vld [vmem:[#allocation2 + $0x2c] ss:$16 sps:$4 sm:$0xff]   ;;  %v5405_v17 = vld [vmem:[#allocation2 + $0x28] ss:$16 sps:$4 sm:$0xff]  }
 0x103   : > { %2446 = vmatprep.subr.bf16.mxu0 %v5309_v9  ;;  %2472 = vmatprep.mubr.bf16.mxu0 %v6578_v23  ;;  %v5412_v9 = vld [vmem:[%s6464_s1 + $0x968] ss:$40 sps:$4 sm:$0xff]  }
 0x104   : > { %2536 = vmatmul.mubr.bf16.gmra.mrb[4].mxu1 %v6567_v16 }
 0x105   : > { %2551 = vmatpush1.bf16.msra.mxu1 %v5334_v20  ;;  %2578 = vmatprep.mubr.bf16.mxu1 %v6578_v23  ;;  %v5427_v20 = vld [vmem:[%s6464_s1 + $0x18] ss:$40 sps:$4 sm:$0xff]  }
 0x106   : > { %2447 = vmatpush1.bf16.msra.mxu0 %v5307_v12  ;;  %2552 = vmatprep.subr.bf16.mxu1 %v5342_v21  ;;  %v5411_v12 = vld [vmem:[%s6464_s1 + $0xb4] ss:$40 sps:$4 sm:$0xff]  }
 0x107   : > { %2448 = vmatprep.subr.bf16.mxu0 %v5315_v13  ;;  %v5418_v13 = vld [vmem:[%s6464_s1 + $0x9b8] ss:$40 sps:$4 sm:$0xff]   ;;  %v5435_v21 = vld [vmem:[%s6464_s1 + $0x6c] ss:$40 sps:$4 sm:$0xff]  }
 0x109   : > { %2553 = vmatpush1.bf16.msra.mxu1 %v5340_v25  ;;  %v5433_v25 = vld [vmem:[%s6464_s1 + $0x68] ss:$40 sps:$4 sm:$0xff]  }
 0x10a   : > { %2449 = vmatpush1.bf16.msra.mxu0 %v5313_v18  ;;  %2554 = vmatprep.subr.bf16.mxu1 %v5348_v26  ;;  %v5409_v18 = vld [vmem:[%s6464_s1 + $0xb0] ss:$40 sps:$4 sm:$0xff]   ;;  %v5441_v26 = vld [vmem:[%s6464_s1 + $0xbc] ss:$40 sps:$4 sm:$0xff]  }
 0x10b   : > { %2450 = vmatprep.subr.bf16.mxu0 %v5321_v19  ;;  %v5417_v19 = vld [vmem:[%s6464_s1 + $0x104] ss:$40 sps:$4 sm:$0xff]  }
 0x10d   : > { %2555 = vmatpush1.bf16.msra.mxu1 %v5346_v29  ;;  %v5439_v29 = vld [vmem:[%s6464_s1 + $0xb8] ss:$40 sps:$4 sm:$0xff]  }
 0x10e   : > { %2451 = vmatpush1.bf16.msra.mxu0 %v5319_v22  ;;  %2556 = vmatprep.subr.bf16.mxu1 %v5354_v30  ;;  %v5415_v22 = vld [vmem:[%s6464_s1 + $0x100] ss:$40 sps:$4 sm:$0xff]   ;;  %v5447_v30 = vld [vmem:[%s6464_s1 + $0x10c] ss:$40 sps:$4 sm:$0xff]  }
 0x10f   : > { %2452 = vmatprep.subr.bf16.mxu0 %v5327_v24  ;;  %v5423_v24 = vld [vmem:[%s6464_s1 + $0x154] ss:$40 sps:$4 sm:$0xff]  }
 0x111   : > { %2557 = vmatpush1.bf16.msra.mxu1 %v5352_v33  ;;  %v5445_v33 = vld [vmem:[%s6464_s1 + $0x108] ss:$40 sps:$4 sm:$0xff]  }
 0x112   : > { %2453 = vmatpush1.bf16.msra.mxu0 %v5325_v27  ;;  %2558 = vmatprep.subr.bf16.mxu1 %v5360_v34  ;;  %v5421_v27 = vld [vmem:[%s6464_s1 + $0x150] ss:$40 sps:$4 sm:$0xff]   ;;  %v5453_v34 = vld [vmem:[%s6464_s1 + $0x15c] ss:$40 sps:$4 sm:$0xff]  }
 0x113   : > { %2454 = vmatprep.subr.bf16.mxu0 %v5333_v28  ;;  %v5426_v28 = vld [vmem:[%s6464_s1 + $0x1a4] ss:$40 sps:$4 sm:$0xff]  }
 0x115   : > { %2559 = vmatpush1.bf16.msra.mxu1 %v5358_v37  ;;  %v5451_v37 = vld [vmem:[%s6464_s1 + $0x158] ss:$40 sps:$4 sm:$0xff]  }
 0x116   : > { %2455 = vmatpush1.bf16.msra.mxu0 %v5331_v31  ;;  %2560 = vmatprep.subr.bf16.mxu1 %v5366_v39  ;;  %v5424_v31 = vld [vmem:[%s6464_s1 + $0x1a0] ss:$40 sps:$4 sm:$0xff]   ;;  %v5459_v39 = vld [vmem:[%s6464_s1 + $0x1ac] ss:$40 sps:$4 sm:$0xff]  }
 0x117   : > { %2456 = vmatprep.subr.bf16.mxu0 %v5339_v32  ;;  %v5432_v32 = vld [vmem:[%s6464_s1 + $0x1f4] ss:$40 sps:$4 sm:$0xff]  }
 0x119   : > { %2561 = vmatpush1.bf16.msra.mxu1 %v5364_v42  ;;  %v5465_v42 = vld [vmem:[%s6464_s1 + $0x1fc] ss:$40 sps:$4 sm:$0xff]  }
 0x11a   : > { %2457 = vmatpush1.bf16.msra.mxu0 %v5337_v35  ;;  %2562 = vmatprep.subr.bf16.mxu1 %v5372_v43  ;;  %v5430_v35 = vld [vmem:[%s6464_s1 + $0x1f0] ss:$40 sps:$4 sm:$0xff]  }
 0x11b   : > { %2458 = vmatprep.subr.bf16.mxu0 %v5345_v36  ;;  %v5438_v36 = vld [vmem:[%s6464_s1 + $0x244] ss:$40 sps:$4 sm:$0xff]   ;;  %v5442_v43 = vld [vmem:[%s6464_s1 + $0x290] ss:$40 sps:$4 sm:$0xff]  }
 0x11d   : > { %2563 = vmatpush1.bf16.msra.mxu1 %v5370_v46  ;;  %v5471_v46 = vld [vmem:[%s6464_s1 + $0x24c] ss:$40 sps:$4 sm:$0xff]  }
 0x11e   : > { %2459 = vmatpush1.bf16.msra.mxu0 %v5343_v40  ;;  %2564 = vmatprep.subr.bf16.mxu1 %v5381_v47  ;;  %v5436_v40 = vld [vmem:[%s6464_s1 + $0x240] ss:$40 sps:$4 sm:$0xff]  }
 0x11f   : > { %2460 = vmatprep.subr.bf16.mxu0 %v5351_v41  ;;  %v5444_v41 = vld [vmem:[%s6464_s1 + $0x294] ss:$40 sps:$4 sm:$0xff]   ;;  %v5448_v47 = vld [vmem:[%s6464_s1 + $0x2e0] ss:$40 sps:$4 sm:$0xff]  }
 0x121   : > { %2565 = vmatpush1.bf16.msra.mxu1 %v5379_v50  ;;  %v5477_v50 = vld [vmem:[%s6464_s1 + $0x29c] ss:$40 sps:$4 sm:$0xff]  }
 0x122   : > { %2461 = vmatpush1.bf16.msra.mxu0 %v5349_v44  ;;  %2566 = vmatprep.subr.bf16.mxu1 %v5387_v51  ;;  %v5450_v44 = vld [vmem:[%s6464_s1 + $0x2e4] ss:$40 sps:$4 sm:$0xff]   ;;  %v5454_v51 = vld [vmem:[%s6464_s1 + $0x330] ss:$40 sps:$4 sm:$0xff]  }
 0x123   : > { %2462 = vmatprep.subr.bf16.mxu0 %v5357_v45  ;;  %v5463_v45 = vld [vmem:[%s6464_s1 + $0x1f8] ss:$40 sps:$4 sm:$0xff]  }
 0x125   : > { %2567 = vmatpush1.bf16.msra.mxu1 %v5385_v54  ;;  %v5483_v54 = vld [vmem:[%s6464_s1 + $0x2ec] ss:$40 sps:$4 sm:$0xff]  }
 0x126   : > { %2463 = vmatpush1.bf16.msra.mxu0 %v5355_v48  ;;  %2568 = vmatprep.subr.bf16.mxu1 %v5393_v55  ;;  %v5456_v48 = vld [vmem:[%s6464_s1 + $0x334] ss:$40 sps:$4 sm:$0xff]   ;;  %v5460_v55 = vld [vmem:[%s6464_s1 + $0x380] ss:$40 sps:$4 sm:$0xff]  }
 0x127   : > { %2464 = vmatprep.subr.bf16.mxu0 %v5363_v49  ;;  %v5469_v49 = vld [vmem:[%s6464_s1 + $0x248] ss:$40 sps:$4 sm:$0xff]  }
 0x129   : > { %2569 = vmatpush1.bf16.msra.mxu1 %v5391_v58  ;;  %v5489_v58 = vld [vmem:[%s6464_s1 + $0x33c] ss:$40 sps:$4 sm:$0xff]  }
 0x12a   : > { %2465 = vmatpush1.bf16.msra.mxu0 %v5361_v52  ;;  %2570 = vmatprep.subr.bf16.mxu1 %v5399_v59  ;;  %v5462_v52 = vld [vmem:[%s6464_s1 + $0x384] ss:$40 sps:$4 sm:$0xff]   ;;  %v5466_v59 = vld [vmem:[%s6464_s1 + $0x3d0] ss:$40 sps:$4 sm:$0xff]  }
 0x12b   : > { %2466 = vmatprep.subr.bf16.mxu0 %v5369_v53  ;;  %v5475_v53 = vld [vmem:[%s6464_s1 + $0x298] ss:$40 sps:$4 sm:$0xff]  }
 0x12d   : > { %2571 = vmatpush1.bf16.msra.mxu1 %v5397_v62  ;;  %v5495_v62 = vld [vmem:[%s6464_s1 + $0x38c] ss:$40 sps:$4 sm:$0xff]  }
 0x12e   : > { %2467 = vmatpush1.bf16.msra.mxu0 %v5367_v56  ;;  %2572 = vmatprep.subr.bf16.mxu1 %v5408_v63  ;;  %v5468_v56 = vld [vmem:[%s6464_s1 + $0x3d4] ss:$40 sps:$4 sm:$0xff]   ;;  %v5472_v63 = vld [vmem:[%s6464_s1 + $0x420] ss:$40 sps:$4 sm:$0xff]  }
 0x12f   : > { %2468 = vmatprep.subr.bf16.mxu0 %v5378_v57  ;;  %v5481_v57 = vld [vmem:[%s6464_s1 + $0x2e8] ss:$40 sps:$4 sm:$0xff]  }
 0x131   : > { %2573 = vmatpush1.bf16.msra.mxu1 %v5406_v3  ;;  %v5501_v3 = vld [vmem:[%s6464_s1 + $0x3dc] ss:$40 sps:$4 sm:$0xff]  }
 0x132   : > { %2469 = vmatpush1.bf16.msra.mxu0 %v5376_v60  ;;  %2574 = vmatprep.subr.bf16.mxu1 %v5414_v4  ;;  %v5474_v60 = vld [vmem:[%s6464_s1 + $0x424] ss:$40 sps:$4 sm:$0xff]   ;;  %v5478_v4 = vld [vmem:[%s6464_s1 + $0x470] ss:$40 sps:$4 sm:$0xff]  }
 0x133   : > { %2470 = vmatprep.subr.bf16.mxu0 %v5384_v61  ;;  %v5487_v61 = vld [vmem:[%s6464_s1 + $0x338] ss:$40 sps:$4 sm:$0xff]  }
 0x135   : > { %2575 = vmatpush1.bf16.msra.mxu1 %v5412_v9  ;;  %v5492_v9 = vld [vmem:[%s6464_s1 + $0x514] ss:$40 sps:$4 sm:$0xff]  }
 0x136   : > { %2471 = vmatpush1.bf16.msra.mxu0 %v5382_v1  ;;  %2576 = vmatprep.subr.bf16.mxu1 %v5420_v10  ;;  %v5480_v1 = vld [vmem:[%s6464_s1 + $0x474] ss:$40 sps:$4 sm:$0xff]   ;;  %v5505_v10 = vld [vmem:[%s6464_s1 + $0x428] ss:$40 sps:$4 sm:$0xff]  }
 0x137   : > { %2599 = vmatprep.subr.bf16.mxu0 %v5396_v2  ;;  %v5493_v2 = vld [vmem:[%s6464_s1 + $0x388] ss:$40 sps:$4 sm:$0xff]  }
 0x139   : > { %2473 = vmatmul.mubr.bf16.vlgmr.msra.gmra.mrb[0].mxu0 %v5390_v5  ;;  %2577 = vmatpush1.bf16.msra.mxu1 %v5418_v13  ;;  %v5498_v13 = vld [vmem:[%s6464_s1 + $0x564] ss:$40 sps:$4 sm:$0xff]  }
 0x13a   : > { %2600 = vmatpush1.bf16.msra.mxu0 %v5394_v6  ;;  %2482 = vmatprep.mubr.bf16.mxu0 %v5403_v8  ;;  %v5499_v6 = vld [vmem:[%s6464_s1 + $0x3d8] ss:$40 sps:$4 sm:$0xff]  }
 0x13b   : > { %2601 = vmatprep.subr.bf16.mxu0 %v5402_v7  ;;  %2705 = vmatprep.subr.bf16.mxu1 %v5429_v14  ;;  %v5507_v7 = vld [vmem:[%s6464_s1 + $0x42c] ss:$40 sps:$4 sm:$0xff]   ;;  %v5511_v14 = vld [vmem:[%s6464_s1 + $0x478] ss:$40 sps:$4 sm:$0xff]  }
 0x13c   : > { %2579 = vmatmul.mubr.bf16.vlgmr.msra.gmra.mrb[0].mxu1 %v5390_v5  ;;  %v5486_v5 = vld [vmem:[%s6464_s1 + $0x4c4] ss:$40 sps:$4 sm:$0xff]  }
 0x13d   : > { %2706 = vmatpush1.bf16.msra.mxu1 %v5427_v20  ;;  %2588 = vmatprep.mubr.bf16.mxu1 %v5403_v8  ;;  %v5484_v8 = vld [vmem:[%s6464_s1 + $0x4c0] ss:$40 sps:$4 sm:$0xff]  }
 0x13e   : > { %2602 = vmatpush1.bf16.msra.mxu0 %v5400_v11  ;;  %2707 = vmatprep.subr.bf16.mxu1 %v5435_v21  ;;  %v5513_v11 = vld [vmem:[%s6464_s1 + $0x47c] ss:$40 sps:$4 sm:$0xff]   ;;  %v5517_v20 = vld [vmem:[%s6464_s1 + $0x4c8] ss:$40 sps:$4 sm:$0xff]  }
 0x13f   : > { %2603 = vmatprep.subr.bf16.mxu0 %v5411_v12  ;;  %v5490_v12 = vld [vmem:[%s6464_s1 + $0x510] ss:$40 sps:$4 sm:$0xff]   ;;  %v5525_v21 = vld [vmem:[%s6464_s1 + $0x51c] ss:$40 sps:$4 sm:$0xff]  }
 0x141   : > { %2483 = vmatmul.mubr.bf16.gmra.mrb[4].mxu0 %v5405_v17  ;;  %2708 = vmatpush1.bf16.msra.mxu1 %v5433_v25  ;;  %v5508_v25 = vld [vmem:[%s6464_s1 + $0x600] ss:$40 sps:$4 sm:$0xff]  }
 0x142   : > { %2604 = vmatpush1.bf16.msra.mxu0 %v5409_v18  ;;  %2631 = vmatprep.mubr.bf16.mxu0 %v6518_v38  ;;  %v5496_v18 = vld [vmem:[%s6464_s1 + $0x560] ss:$40 sps:$4 sm:$0xff]  }
 0x143   : > { %2605 = vmatprep.subr.bf16.mxu0 %v5417_v19  ;;  %2709 = vmatprep.subr.bf16.mxu1 %v5441_v26  ;;  %v5504_v19 = vld [vmem:[%s6464_s1 + $0x5b4] ss:$40 sps:$4 sm:$0xff]  }
 0x144   : > { %2589 = vmatmul.mubr.bf16.gmra.mrb[4].mxu1 %v5405_v17  ;;  %v5519_v17 = vld [vmem:[%s6464_s1 + $0x4cc] ss:$40 sps:$4 sm:$0xff]  }
 0x145   : > { %2710 = vmatpush1.bf16.msra.mxu1 %v5439_v29  ;;  %2737 = vmatprep.mubr.bf16.mxu1 %v6518_v38  ;;  %v5457_v38 = vld [vmem:[%s6464_s1 + $0x1a8] ss:$40 sps:$4 sm:$0xff]   ;;  %v5531_v26 = vld [vmem:[%s6464_s1 + $0x56c] ss:$40 sps:$4 sm:$0xff]  }
 0x146   : > { %2606 = vmatpush1.bf16.msra.mxu0 %v5415_v22  ;;  %2711 = vmatprep.subr.bf16.mxu1 %v5447_v30  ;;  %v5502_v22 = vld [vmem:[%s6464_s1 + $0x5b0] ss:$40 sps:$4 sm:$0xff]   ;;  %v5537_v30 = vld [vmem:[%s6464_s1 + $0x5bc] ss:$40 sps:$4 sm:$0xff]  }
 0x147   : > { %2607 = vmatprep.subr.bf16.mxu0 %v5423_v24  ;;  %v5510_v24 = vld [vmem:[%s6464_s1 + $0x604] ss:$40 sps:$4 sm:$0xff]   ;;  %v5529_v29 = vld [vmem:[%s6464_s1 + $0x568] ss:$40 sps:$4 sm:$0xff]  }
 0x149   : > { %2712 = vmatpush1.bf16.msra.mxu1 %v5445_v33  ;;  %v5535_v33 = vld [vmem:[%s6464_s1 + $0x5b8] ss:$40 sps:$4 sm:$0xff]  }
 0x14a   : > { %2608 = vmatpush1.bf16.msra.mxu0 %v5421_v27  ;;  %2713 = vmatprep.subr.bf16.mxu1 %v5453_v34  ;;  %v5516_v27 = vld [vmem:[%s6464_s1 + $0x654] ss:$40 sps:$4 sm:$0xff]  }
 0x14b   : > { %2609 = vmatprep.subr.bf16.mxu0 %v5426_v28  ;;  %v6709_v28 = vld [vmem:[#allocation2] ss:$16 sps:$4 sm:$0xff]   ;;  %v5543_v34 = vld [vmem:[%s6464_s1 + $0x60c] ss:$40 sps:$4 sm:$0xff]  }
 0x14d   : > { %2714 = vmatpush1.bf16.msra.mxu1 %v5451_v37  ;;  %v5526_v37 = vld [vmem:[%s6464_s1 + $0x6f0] ss:$40 sps:$4 sm:$0xff]  }
 0x14e   : > { %2610 = vmatpush1.bf16.msra.mxu0 %v5424_v31  ;;  %2715 = vmatprep.subr.bf16.mxu1 %v5459_v39  ;;  %v5514_v31 = vld [vmem:[%s6464_s1 + $0x650] ss:$40 sps:$4 sm:$0xff]   ;;  %v5549_v39 = vld [vmem:[%s6464_s1 + $0x65c] ss:$40 sps:$4 sm:$0xff]  }
 0x14f   : > { %2611 = vmatprep.subr.bf16.mxu0 %v5432_v32  ;;  %v5522_v32 = vld [vmem:[%s6464_s1 + $0x6a4] ss:$40 sps:$4 sm:$0xff]  }
 0x151   : > { %2716 = vmatpush1.bf16.msra.mxu1 %v5457_v38  ;;  %v5555_v38 = vld [vmem:[%s6464_s1 + $0x6ac] ss:$40 sps:$4 sm:$0xff]  }
 0x152   : > { %2612 = vmatpush1.bf16.msra.mxu0 %v5430_v35  ;;  %2717 = vmatprep.subr.bf16.mxu1 %v5465_v42  ;;  %v5520_v35 = vld [vmem:[%s6464_s1 + $0x6a0] ss:$40 sps:$4 sm:$0xff]   ;;  %v5540_v42 = vld [vmem:[%s6464_s1 + $0x794] ss:$40 sps:$4 sm:$0xff]  }
 0x153   : > { %2613 = vmatprep.subr.bf16.mxu0 %v5438_v36  ;;  %v5528_v36 = vld [vmem:[%s6464_s1 + $0x6f4] ss:$40 sps:$4 sm:$0xff]  }
 0x155   : > { %2718 = vmatpush1.bf16.msra.mxu1 %v5463_v45  ;;  %v5546_v45 = vld [vmem:[%s6464_s1 + $0x7e4] ss:$40 sps:$4 sm:$0xff]  }
 0x156   : > { %2614 = vmatpush1.bf16.msra.mxu0 %v5436_v40  ;;  %2719 = vmatprep.subr.bf16.mxu1 %v5471_v46  ;;  %v5534_v40 = vld [vmem:[%s6464_s1 + $0x744] ss:$40 sps:$4 sm:$0xff]   ;;  %v5559_v46 = vld [vmem:[%s6464_s1 + $0x6f8] ss:$40 sps:$4 sm:$0xff]  }
 0x157   : > { %2615 = vmatprep.subr.bf16.mxu0 %v5444_v41  ;;  %v5547_v41 = vld [vmem:[%s6464_s1 + $0x658] ss:$40 sps:$4 sm:$0xff]  }
 0x159   : > { %2720 = vmatpush1.bf16.msra.mxu1 %v5469_v49  ;;  %v5552_v49 = vld [vmem:[%s6464_s1 + $0x834] ss:$40 sps:$4 sm:$0xff]  }
 0x15a   : > { %2616 = vmatpush1.bf16.msra.mxu0 %v5442_v43  ;;  %2721 = vmatprep.subr.bf16.mxu1 %v5477_v50  ;;  %v5553_v43 = vld [vmem:[%s6464_s1 + $0x6a8] ss:$40 sps:$4 sm:$0xff]  }
 0x15b   : > { %2617 = vmatprep.subr.bf16.mxu0 %v5450_v44  ;;  %v5561_v44 = vld [vmem:[%s6464_s1 + $0x6fc] ss:$40 sps:$4 sm:$0xff]   ;;  %v5565_v50 = vld [vmem:[%s6464_s1 + $0x748] ss:$40 sps:$4 sm:$0xff]  }
 0x15d   : > { %2722 = vmatpush1.bf16.msra.mxu1 %v5475_v53  ;;  %v5558_v53 = vld [vmem:[%s6464_s1 + $0x884] ss:$40 sps:$4 sm:$0xff]  }
 0x15e   : > { %2618 = vmatpush1.bf16.msra.mxu0 %v5448_v47  ;;  %2723 = vmatprep.subr.bf16.mxu1 %v5483_v54  ;;  %v5544_v47 = vld [vmem:[%s6464_s1 + $0x7e0] ss:$40 sps:$4 sm:$0xff]  }
 0x15f   : > { %2619 = vmatprep.subr.bf16.mxu0 %v5456_v48  ;;  %v5567_v48 = vld [vmem:[%s6464_s1 + $0x74c] ss:$40 sps:$4 sm:$0xff]   ;;  %v5571_v54 = vld [vmem:[%s6464_s1 + $0x798] ss:$40 sps:$4 sm:$0xff]  }
 0x161   : > { %2724 = vmatpush1.bf16.msra.mxu1 %v5481_v57  ;;  %v5564_v57 = vld [vmem:[%s6464_s1 + $0x8d4] ss:$40 sps:$4 sm:$0xff]  }
 0x162   : > { %2620 = vmatpush1.bf16.msra.mxu0 %v5454_v51  ;;  %2725 = vmatprep.subr.bf16.mxu1 %v5489_v58  ;;  %v5550_v51 = vld [vmem:[%s6464_s1 + $0x830] ss:$40 sps:$4 sm:$0xff]  }
 0x163   : > { %2621 = vmatprep.subr.bf16.mxu0 %v5462_v52  ;;  %v5573_v52 = vld [vmem:[%s6464_s1 + $0x79c] ss:$40 sps:$4 sm:$0xff]   ;;  %v5577_v58 = vld [vmem:[%s6464_s1 + $0x7e8] ss:$40 sps:$4 sm:$0xff]  }
 0x165   : > { %2726 = vmatpush1.bf16.msra.mxu1 %v5487_v61  ;;  %v5570_v61 = vld [vmem:[%s6464_s1 + $0x924] ss:$40 sps:$4 sm:$0xff]  }
 0x166   : > { %2622 = vmatpush1.bf16.msra.mxu0 %v5460_v55  ;;  %2727 = vmatprep.subr.bf16.mxu1 %v5495_v62  ;;  %v5556_v55 = vld [vmem:[%s6464_s1 + $0x880] ss:$40 sps:$4 sm:$0xff]  }
 0x167   : > { %2623 = vmatprep.subr.bf16.mxu0 %v5468_v56  ;;  %v5579_v56 = vld [vmem:[%s6464_s1 + $0x7ec] ss:$40 sps:$4 sm:$0xff]   ;;  %v5583_v62 = vld [vmem:[%s6464_s1 + $0x838] ss:$40 sps:$4 sm:$0xff]  }
 0x169   : > { %2728 = vmatpush1.bf16.msra.mxu1 %v5493_v2  ;;  %v5576_v2 = vld [vmem:[%s6464_s1 + $0x974] ss:$40 sps:$4 sm:$0xff]  }
 0x16a   : > { %2624 = vmatpush1.bf16.msra.mxu0 %v5466_v59  ;;  %2729 = vmatprep.subr.bf16.mxu1 %v5501_v3  ;;  %v5562_v59 = vld [vmem:[%s6464_s1 + $0x8d0] ss:$40 sps:$4 sm:$0xff]  }
 0x16b   : > { %2625 = vmatprep.subr.bf16.mxu0 %v5474_v60  ;;  %v5585_v60 = vld [vmem:[%s6464_s1 + $0x83c] ss:$40 sps:$4 sm:$0xff]   ;;  %v5586_v3 = vld [vmem:[%s6464_s1 + $0x888] ss:$40 sps:$4 sm:$0xff]  }
 0x16d   : > { %2730 = vmatpush1.bf16.msra.mxu1 %v5499_v6  ;;  %v5582_v6 = vld [vmem:[%s6464_s1 + $0x9c4] ss:$40 sps:$4 sm:$0xff]  }
 0x16e   : > { %2626 = vmatpush1.bf16.msra.mxu0 %v5472_v63  ;;  %2731 = vmatprep.subr.bf16.mxu1 %v5507_v7  ;;  %v5568_v63 = vld [vmem:[%s6464_s1 + $0x920] ss:$40 sps:$4 sm:$0xff]  }
 0x16f   : > { %2627 = vmatprep.subr.bf16.mxu0 %v5480_v1  ;;  %v5588_v1 = vld [vmem:[%s6464_s1 + $0x88c] ss:$40 sps:$4 sm:$0xff]   ;;  %v5592_v7 = vld [vmem:[%s6464_s1 + $0x8d8] ss:$40 sps:$4 sm:$0xff]  }
 0x171   : > { %2732 = vmatpush1.bf16.msra.mxu1 %v5505_v10  ;;  %v5591_v10 = vld [vmem:[%s6464_s1 + $0x24] ss:$40 sps:$4 sm:$0xff]  }
 0x172   : > { %2628 = vmatpush1.bf16.msra.mxu0 %v5478_v4  ;;  %2733 = vmatprep.subr.bf16.mxu1 %v5513_v11  ;;  %v5574_v4 = vld [vmem:[%s6464_s1 + $0x970] ss:$40 sps:$4 sm:$0xff]  }
 0x173   : > { %2629 = vmatprep.subr.bf16.mxu0 %v5486_v5  ;;  %v5594_v5 = vld [vmem:[%s6464_s1 + $0x8dc] ss:$40 sps:$4 sm:$0xff]   ;;  %v5598_v11 = vld [vmem:[%s6464_s1 + $0x928] ss:$40 sps:$4 sm:$0xff]  }
 0x175   : > { %2734 = vmatpush1.bf16.msra.mxu1 %v5511_v14  ;;  %v5597_v14 = vld [vmem:[%s6464_s1 + $0x74] ss:$40 sps:$4 sm:$0xff]  }
 0x176   : > { %2630 = vmatpush1.bf16.msra.mxu0 %v5484_v8  ;;  %2735 = vmatprep.subr.bf16.mxu1 %v5519_v17  ;;  %v5580_v8 = vld [vmem:[%s6464_s1 + $0x9c0] ss:$40 sps:$4 sm:$0xff]  }
 0x177   : > { %2652 = vmatprep.subr.bf16.mxu0 %v5492_v9  ;;  %v5600_v9 = vld [vmem:[%s6464_s1 + $0x92c] ss:$40 sps:$4 sm:$0xff]   ;;  %v5604_v17 = vld [vmem:[%s6464_s1 + $0x978] ss:$40 sps:$4 sm:$0xff]  }
 0x179   : > { %2632 = vmatmul.mubr.bf16.vlgmr.msra.gmra.mrb[8].mxu0 %v6547_v0  ;;  %2736 = vmatpush1.bf16.msra.mxu1 %v5517_v20  ;;  %v5523_v0 = vld [vmem:[%s6464_s1 + $0x518] ss:$40 sps:$4 sm:$0xff]  }
 0x17a   : > { %2653 = vmatpush1.bf16.msra.mxu0 %v5490_v12  ;;  %2641 = vmatprep.mubr.bf16.mxu0 %v6565_v15  ;;  %v5589_v12 = vld [vmem:[%s6464_s1 + $0x20] ss:$40 sps:$4 sm:$0xff]  }
 0x17b   : > { %2654 = vmatprep.subr.bf16.mxu0 %v5498_v13  ;;  %2758 = vmatprep.subr.bf16.mxu1 %v5525_v21  ;;  %v5606_v13 = vld [vmem:[%s6464_s1 + $0x97c] ss:$40 sps:$4 sm:$0xff]   ;;  %v6771_v20 = vld [vmem:[#allocation2 + $0x8] ss:$16 sps:$4 sm:$0xff]  }
 0x17c   : > { %2738 = vmatmul.mubr.bf16.vlgmr.msra.gmra.mrb[8].mxu1 %v6709_v28  ;;  %v5603_v21 = vld [vmem:[%s6464_s1 + $0xc4] ss:$40 sps:$4 sm:$0xff]  }
 0x17d   : > { %2759 = vmatpush1.bf16.msra.mxu1 %v5523_v0  ;;  %2747 = vmatprep.mubr.bf16.mxu1 %v6565_v15  ;;  %v5541_v15 = vld [vmem:[%s6464_s1 + $0x608] ss:$40 sps:$4 sm:$0xff]  }
 0x17e   : > { %2655 = vmatpush1.bf16.msra.mxu0 %v5496_v18  ;;  %2760 = vmatprep.subr.bf16.mxu1 %v5531_v26  ;;  %v5595_v18 = vld [vmem:[%s6464_s1 + $0x70] ss:$40 sps:$4 sm:$0xff]   ;;  %v5601_v0 = vld [vmem:[%s6464_s1 + $0xc0] ss:$40 sps:$4 sm:$0xff]   ;;  %v5609_v26 = vld [vmem:[%s6464_s1 + $0x114] ss:$40 sps:$4 sm:$0xff]  }
 0x17f   : > { %2656 = vmatprep.subr.bf16.mxu0 %v5504_v19  ;;  %v5612_v19 = vld [vmem:[%s6464_s1 + $0x9cc] ss:$40 sps:$4 sm:$0xff]  }
 0x181   : > { %2642 = vmatmul.mubr.bf16.gmra.mrb[12].mxu0 %v6567_v16  ;;  %2761 = vmatpush1.bf16.msra.mxu1 %v5529_v29  ;;  %v5607_v29 = vld [vmem:[%s6464_s1 + $0x110] ss:$40 sps:$4 sm:$0xff]  }
 0x182   : > { %2657 = vmatpush1.bf16.msra.mxu0 %v5502_v22  ;;  %2684 = vmatprep.mubr.bf16.mxu0 %v6578_v23  ;;  %v6775_v22 = vld [vmem:[#allocation2 + $0x2c] ss:$16 sps:$4 sm:$0xff]  }
 0x183   : > { %2658 = vmatprep.subr.bf16.mxu0 %v5510_v24  ;;  %2762 = vmatprep.subr.bf16.mxu1 %v5537_v30  ;;  %v5610_v24 = vld [vmem:[%s6464_s1 + $0x9c8] ss:$40 sps:$4 sm:$0xff]   ;;  %v5696_v30 = vld [vmem:[%s6474_s27 + $0x48] sm:$0xff]  }
 0x184   : > { %2748 = vmatmul.mubr.bf16.gmra.mrb[12].mxu1 %v6567_v16  ;;  %v5532_v16 = vld [vmem:[%s6464_s1 + $0x740] ss:$40 sps:$4 sm:$0xff]  }
 0x185   : > { %2763 = vmatpush1.bf16.msra.mxu1 %v5535_v33  ;;  %2790 = vmatprep.mubr.bf16.mxu1 %v6578_v23  ;;  %v5538_v23 = vld [vmem:[%s6464_s1 + $0x790] ss:$40 sps:$4 sm:$0xff]   ;;  %v5697_v33 = vld [vmem:[%s6474_s27 + $0x8] sm:$0xff]  }
 0x186   : > { %2659 = vmatpush1.bf16.msra.mxu0 %v5508_v25  ;;  %2764 = vmatprep.subr.bf16.mxu1 %v5543_v34  ;;  %v5691_v25 = vld [vmem:[%s6474_s27 + $0x40] sm:$0xff]   ;;  %v5613_v34 = vld [vmem:[%s6464_s1 + $0x160] ss:$40 sps:$4 sm:$0xff]  }
 0x187   : > { %2660 = vmatprep.subr.bf16.mxu0 %v5516_v27  ;;  %v5692_v27 = vld [vmem:[%s6474_s27] sm:$0xff]  }
 0x189   : > { %2765 = vmatpush1.bf16.msra.mxu1 %v5541_v15  ;;  %v5618_v15 = vld [vmem:[%s6464_s1 + $0x1b4] ss:$40 sps:$4 sm:$0xff]  }
 0x18a   : > { %2661 = vmatpush1.bf16.msra.mxu0 %v5514_v31  ;;  %2766 = vmatprep.subr.bf16.mxu1 %v5549_v39  ;;  %v6785_v31 = vld [vmem:[#allocation2 + $0x28] ss:$16 sps:$4 sm:$0xff]  }
 0x18b   : > { %2662 = vmatprep.subr.bf16.mxu0 %v5522_v32  ;;  %v5615_v32 = vld [vmem:[%s6464_s1 + $0x164] ss:$40 sps:$4 sm:$0xff]   ;;  %v5616_v39 = vld [vmem:[%s6464_s1 + $0x1b0] ss:$40 sps:$4 sm:$0xff]  }
 0x18d   : > { %2767 = vmatpush1.bf16.msra.mxu1 %v5547_v41  ;;  %v5621_v41 = vld [vmem:[%s6464_s1 + $0x204] ss:$40 sps:$4 sm:$0xff]  }
 0x18e   : > { %2663 = vmatpush1.bf16.msra.mxu0 %v5520_v35  ;;  %2768 = vmatprep.subr.bf16.mxu1 %v5555_v38  ;;  %v5945_v35 = vld [vmem:[#allocation2 + $0x4] ss:$16 sps:$4 sm:$0xff]  }
 0x18f   : > { %2664 = vmatprep.subr.bf16.mxu0 %v5528_v36  ;;  %v5701_v36 = vld [vmem:[%s6474_s27 + $0x50] sm:$0xff]   ;;  %v5705_v38 = vld [vmem:[%s6474_s27 + $0x60] sm:$0xff]  }
 0x191   : > { %2769 = vmatpush1.bf16.msra.mxu1 %v5553_v43  ;;  %v5624_v43 = vld [vmem:[%s6464_s1 + $0x254] ss:$40 sps:$4 sm:$0xff]  }
 0x192   : > { %2665 = vmatpush1.bf16.msra.mxu0 %v5526_v37  ;;  %2770 = vmatprep.subr.bf16.mxu1 %v5561_v44  ;;  %v5702_v37 = vld [vmem:[%s6474_s27 + $0x10] sm:$0xff]   ;;  %v5707_v44 = vld [vmem:[%s6474_s27 + $0x68] sm:$0xff]  }
 0x193   : > { %2666 = vmatprep.subr.bf16.mxu0 %v5534_v40  ;;  %v5703_v40 = vld [vmem:[%s6474_s27 + $0x58] sm:$0xff]  }
 0x195   : > { %2771 = vmatpush1.bf16.msra.mxu1 %v5559_v46  ;;  %v5627_v46 = vld [vmem:[%s6464_s1 + $0x2a4] ss:$40 sps:$4 sm:$0xff]  }
 0x196   : > { %2667 = vmatpush1.bf16.msra.mxu0 %v5532_v16  ;;  %2772 = vmatprep.subr.bf16.mxu1 %v5567_v48  ;;  %v5704_v16 = vld [vmem:[%s6474_s27 + $0x18] sm:$0xff]   ;;  %v5709_v48 = vld [vmem:[%s6474_s27 + $0x70] sm:$0xff]  }
 0x197   : > { %2668 = vmatprep.subr.bf16.mxu0 %v5540_v42  ;;  %v5619_v42 = vld [vmem:[%s6464_s1 + $0x200] ss:$40 sps:$4 sm:$0xff]  }
 0x199   : > { %2773 = vmatpush1.bf16.msra.mxu1 %v5565_v50  ;;  %v5630_v50 = vld [vmem:[%s6464_s1 + $0x2f4] ss:$40 sps:$4 sm:$0xff]  }
 0x19a   : > { %2669 = vmatpush1.bf16.msra.mxu0 %v5538_v23  ;;  %2774 = vmatprep.subr.bf16.mxu1 %v5573_v52  ;;  %v5706_v23 = vld [vmem:[%s6474_s27 + $0x20] sm:$0xff]   ;;  %v5711_v52 = vld [vmem:[%s6474_s27 + $0x78] sm:$0xff]  }
 0x19b   : > { %2670 = vmatprep.subr.bf16.mxu0 %v5546_v45  ;;  %v5622_v45 = vld [vmem:[%s6464_s1 + $0x250] ss:$40 sps:$4 sm:$0xff]  }
 0x19d   : > { %2775 = vmatpush1.bf16.msra.mxu1 %v5571_v54  ;;  %v5633_v54 = vld [vmem:[%s6464_s1 + $0x344] ss:$40 sps:$4 sm:$0xff]  }
 0x19e   : > { %2671 = vmatpush1.bf16.msra.mxu0 %v5544_v47  ;;  %2776 = vmatprep.subr.bf16.mxu1 %v5579_v56  ;;  %v5708_v47 = vld [vmem:[%s6474_s27 + $0x28] sm:$0xff]   ;;  %v5713_v56 = vld [vmem:[%s6474_s27 + $0xc0] sm:$0xff]  }
 0x19f   : > { %2672 = vmatprep.subr.bf16.mxu0 %v5552_v49  ;;  %v5625_v49 = vld [vmem:[%s6464_s1 + $0x2a0] ss:$40 sps:$4 sm:$0xff]  }
 0x1a1   : > { %2777 = vmatpush1.bf16.msra.mxu1 %v5577_v58  ;;  %v5636_v58 = vld [vmem:[%s6464_s1 + $0x394] ss:$40 sps:$4 sm:$0xff]  }
 0x1a2   : > { %2673 = vmatpush1.bf16.msra.mxu0 %v5550_v51  ;;  %2778 = vmatprep.subr.bf16.mxu1 %v5585_v60  ;;  %v5710_v51 = vld [vmem:[%s6474_s27 + $0x30] sm:$0xff]  }
 0x1a3   : > { %2674 = vmatprep.subr.bf16.mxu0 %v5558_v53  ;;  %v5628_v53 = vld [vmem:[%s6464_s1 + $0x2f0] ss:$40 sps:$4 sm:$0xff]   ;;  %v5639_v60 = vld [vmem:[%s6464_s1 + $0x3e4] ss:$40 sps:$4 sm:$0xff]  }
 0x1a5   : > { %2779 = vmatpush1.bf16.msra.mxu1 %v5583_v62  ;;  %v5642_v62 = vld [vmem:[%s6464_s1 + $0x434] ss:$40 sps:$4 sm:$0xff]  }
 0x1a6   : > { %2675 = vmatpush1.bf16.msra.mxu0 %v5556_v55  ;;  %2780 = vmatprep.subr.bf16.mxu1 %v5588_v1  ;;  %v5712_v55 = vld [vmem:[%s6474_s27 + $0x38] sm:$0xff]  }
 0x1a7   : > { %2676 = vmatprep.subr.bf16.mxu0 %v5564_v57  ;;  %v5631_v57 = vld [vmem:[%s6464_s1 + $0x340] ss:$40 sps:$4 sm:$0xff]   ;;  %v5645_v1 = vld [vmem:[%s6464_s1 + $0x484] ss:$40 sps:$4 sm:$0xff]  }
 0x1a9   : > { %2781 = vmatpush1.bf16.msra.mxu1 %v5586_v3  ;;  %v5648_v3 = vld [vmem:[%s6464_s1 + $0x4d4] ss:$40 sps:$4 sm:$0xff]  }
 0x1aa   : > { %2677 = vmatpush1.bf16.msra.mxu0 %v5562_v59  ;;  %2782 = vmatprep.subr.bf16.mxu1 %v5594_v5  ;;  %v5634_v59 = vld [vmem:[%s6464_s1 + $0x390] ss:$40 sps:$4 sm:$0xff]   ;;  %v5651_v5 = vld [vmem:[%s6464_s1 + $0x524] ss:$40 sps:$4 sm:$0xff]  }
 0x1ab   : > { %2678 = vmatprep.subr.bf16.mxu0 %v5570_v61  ;;  %v5637_v61 = vld [vmem:[%s6464_s1 + $0x3e0] ss:$40 sps:$4 sm:$0xff]  }
 0x1ad   : > { %2783 = vmatpush1.bf16.msra.mxu1 %v5592_v7  ;;  %v5654_v7 = vld [vmem:[%s6464_s1 + $0x574] ss:$40 sps:$4 sm:$0xff]  }
 0x1ae   : > { %2679 = vmatpush1.bf16.msra.mxu0 %v5568_v63  ;;  %2784 = vmatprep.subr.bf16.mxu1 %v5600_v9  ;;  %v5640_v63 = vld [vmem:[%s6464_s1 + $0x430] ss:$40 sps:$4 sm:$0xff]   ;;  %v5946_v9 = vld [vmem:[#allocation2 + $0x24] ss:$16 sps:$4 sm:$0xff]  }
 0x1af   : > { %2680 = vmatprep.subr.bf16.mxu0 %v5576_v2  ;;  %v5643_v2 = vld [vmem:[%s6464_s1 + $0x480] ss:$40 sps:$4 sm:$0xff]  }
 0x1b1   : > { %2785 = vmatpush1.bf16.msra.mxu1 %v5598_v11  ;;  %v697_v11 = vlaneseq }
 0x1b2   : > { %2681 = vmatpush1.bf16.msra.mxu0 %v5574_v4  ;;  %2786 = vmatprep.subr.bf16.mxu1 %v5606_v13  ;;  %v5646_v4 = vld [vmem:[%s6464_s1 + $0x4d0] ss:$40 sps:$4 sm:$0xff]   ;;  %v5660_v13 = vld [vmem:[%s6464_s1 + $0x614] ss:$40 sps:$4 sm:$0xff]  }
 0x1b3   : > { %2682 = vmatprep.subr.bf16.mxu0 %v5582_v6  ;;  %v5649_v6 = vld [vmem:[%s6464_s1 + $0x520] ss:$40 sps:$4 sm:$0xff]  }
 0x1b5   : > { %2787 = vmatpush1.bf16.msra.mxu1 %v5604_v17  ;;  %v5947_v17 = vld [vmem:[#allocation2 + $0x20] ss:$16 sps:$4 sm:$0xff]  }
 0x1b6   : > { %2683 = vmatpush1.bf16.msra.mxu0 %v5580_v8  ;;  %2788 = vmatprep.subr.bf16.mxu1 %v5612_v19  ;;  %v5652_v8 = vld [vmem:[%s6464_s1 + $0x570] ss:$40 sps:$4 sm:$0xff]   ;;  %v5663_v19 = vld [vmem:[%s6464_s1 + $0x664] ss:$40 sps:$4 sm:$0xff]  }
 0x1b7   : > { %2811 = vmatprep.subr.bf16.mxu0 %v5591_v10  ;;  %v5657_v10 = vld [vmem:[%s6464_s1 + $0x5c4] ss:$40 sps:$4 sm:$0xff]  }
 0x1b9   : > { %2685 = vmatmul.mubr.bf16.vlgmr.msra.gmra.mrb[8].mxu0 %v6771_v20  ;;  %2789 = vmatpush1.bf16.msra.mxu1 %v5610_v24  ;;  %v5661_v24 = vld [vmem:[%s6464_s1 + $0x660] ss:$40 sps:$4 sm:$0xff]  }
 0x1ba   : > { %2812 = vmatpush1.bf16.msra.mxu0 %v5589_v12  ;;  %2694 = vmatprep.mubr.bf16.mxu0 %v6775_v22  ;;  %v5655_v12 = vld [vmem:[%s6464_s1 + $0x5c0] ss:$40 sps:$4 sm:$0xff]  }
 0x1bb   : > { %2813 = vmatprep.subr.bf16.mxu0 %v5597_v14  ;;  %4928 = vmatprep.subr.bf16.mxu1 %v5691_v25  ;;  %v6837_v14 = vshrl.u32 %v697_v11, 7 }
 0x1bc   : > { %2791 = vmatmul.mubr.bf16.vlgmr.msra.gmra.mrb[8].mxu1 %v6771_v20 }
 0x1bd   : > { %2800 = vmatprep.mubr.bf16.mxu1 %v6775_v22  ;;  %4929 = vmatpush3.bf16.msra.mxu1 %v5692_v27  ;;  %v703_v25 = vsub.s32 1, %v6837_v14 }
 0x1be   : > { %2814 = vmatpush1.bf16.msra.mxu0 %v5595_v18  ;;  %4930 = vmatprep.subr.bf16.mxu1 %v5696_v30  ;;  %v5948_v18 = vld [vmem:[#allocation2 + $0xc] ss:$16 sps:$4 sm:$0xff]   ;;  %v5664_v30 = vld [vmem:[%s6464_s1 + $0x6b0] ss:$40 sps:$4 sm:$0xff]  }
 0x1bf   : > { %2815 = vmatprep.subr.bf16.mxu0 %v5603_v21  ;;  %v699_v21 = vsub.s32 0, %v6837_v14 }
 0x1c1   : > { %2695 = vmatmul.mubr.bf16.gmra.mrb[12].mxu0 %v6785_v31  ;;  %4931 = vmatpush3.bf16.msra.mxu1 %v5697_v33 }
 0x1c2   : > { %2816 = vmatpush1.bf16.msra.mxu0 %v5601_v0  ;;  %2843 = vmatprep.mubr.bf16.mxu0 %v5945_v35  ;;  %v6844_v0 = vld [vmem:[%s6472_s6] sm:$0xff] }
 0x1c3   : > { %2817 = vmatprep.subr.bf16.mxu0 %v5609_v26  ;;  %4932 = vmatprep.subr.bf16.mxu1 %v5701_v36  ;;  %v5666_v26 = vld [vmem:[%s6464_s1 + $0x6b4] ss:$40 sps:$4 sm:$0xff]   ;;  %v700_v27 = vrot.slane %v6844_v0, %v699_v21 }
 0x1c4   : > { %2801 = vmatmul.mubr.bf16.gmra.mrb[12].mxu1 %v6785_v31 }
 0x1c5   : > { %4933 = vmatpush3.bf16.msra.mxu1 %v5702_v37  ;;  %v5667_v37 = vld [vmem:[%s6464_s1 + $0x700] ss:$40 sps:$4 sm:$0xff]  }
 0x1c6   : > { %2818 = vmatpush1.bf16.msra.mxu0 %v5607_v29  ;;  %4934 = vmatprep.subr.bf16.mxu1 %v5703_v40  ;;  %v704_v29 = vrot.slane %v6844_v0, %v703_v25 }
 0x1c7   : > { %2819 = vmatprep.subr.bf16.mxu0 %v5615_v32  ;;  %v5669_v32 = vld [vmem:[%s6464_s1 + $0x704] ss:$40 sps:$4 sm:$0xff]  }
 0x1c9   : > { %4935 = vmatpush3.bf16.msra.mxu1 %v5704_v16 }
 0x1ca   : > { %2820 = vmatpush1.bf16.msra.mxu0 %v5613_v34  ;;  %4936 = vmatprep.subr.bf16.mxu1 %v5705_v38  ;;  %v5672_v38 = vld [vmem:[%s6464_s1 + $0x754] ss:$40 sps:$4 sm:$0xff]  }
 0x1cb   : > { %2821 = vmatprep.subr.bf16.mxu0 %v5618_v15 }
 0x1cd   : > { %4937 = vmatpush3.bf16.msra.mxu1 %v5706_v23 }
 0x1ce   : > { %2822 = vmatpush1.bf16.msra.mxu0 %v5616_v39  ;;  %4938 = vmatprep.subr.bf16.mxu1 %v5707_v44  ;;  %v707_v39 = vsub.s32 2, %v6837_v14 }
 0x1cf   : > { %2823 = vmatprep.subr.bf16.mxu0 %v5621_v41 }
 0x1d1   : > { %4939 = vmatpush3.bf16.msra.mxu1 %v5708_v47  ;;  %v711_v47 = vsub.s32 3, %v6837_v14 }
 0x1d2   : > { %2824 = vmatpush1.bf16.msra.mxu0 %v5619_v42  ;;  %4940 = vmatprep.subr.bf16.mxu1 %v5709_v48  ;;  %v5675_v48 = vld [vmem:[%s6464_s1 + $0x7a4] ss:$40 sps:$4 sm:$0xff]  }
 0x1d3   : > { %2825 = vmatprep.subr.bf16.mxu0 %v5624_v43 }
 0x1d5   : > { %4941 = vmatpush3.bf16.msra.mxu1 %v5710_v51 }
 0x1d6   : > { %2826 = vmatpush1.bf16.msra.mxu0 %v5622_v45  ;;  %4942 = vmatprep.subr.bf16.mxu1 %v5711_v52  ;;  %v5670_v45 = vld [vmem:[%s6464_s1 + $0x750] ss:$40 sps:$4 sm:$0xff]  }
 0x1d7   : > { %2827 = vmatprep.subr.bf16.mxu0 %v5627_v46  ;;  %v6873_v46 = vrot.slane %v6844_v0, %v707_v39 }
 0x1d9   : > { %4943 = vmatpush3.bf16.msra.mxu1 %v5712_v55  ;;  %v5673_v55 = vld [vmem:[%s6464_s1 + $0x7a0] ss:$40 sps:$4 sm:$0xff]  }
 0x1da   : > { %2828 = vmatpush1.bf16.msra.mxu0 %v5625_v49  ;;  %4950 = vmatprep.subr.bf16.mxu1 %v5713_v56 }
 0x1db   : > { %2829 = vmatprep.subr.bf16.mxu0 %v5630_v50 }
 0x1de   : > { %2830 = vmatpush1.bf16.msra.mxu0 %v5628_v53 }
 0x1df   : > { %2831 = vmatprep.subr.bf16.mxu0 %v5633_v54 }
 0x1e2   : > { %2832 = vmatpush1.bf16.msra.mxu0 %v5631_v57  ;;  %v6886_v57 = vrot.slane %v6844_v0, %v711_v47 }
 0x1e3   : > { %2833 = vmatprep.subr.bf16.mxu0 %v5636_v58 }
 0x1e6   : > { %2834 = vmatpush1.bf16.msra.mxu0 %v5634_v59 }
 0x1e7   : > { %2835 = vmatprep.subr.bf16.mxu0 %v5639_v60 }
 0x1ea   : > { %2836 = vmatpush1.bf16.msra.mxu0 %v5637_v61 }
 0x1eb   : > { %2837 = vmatprep.subr.bf16.mxu0 %v5642_v62  ;;  %v5678_v62 = vld [vmem:[%s6464_s1 + $0x7f4] ss:$40 sps:$4 sm:$0xff]  }
 0x1ee   : > { %2838 = vmatpush1.bf16.msra.mxu0 %v5640_v63 }
 0x1ef   : > { %2839 = vmatprep.subr.bf16.mxu0 %v5645_v1 }
 0x1f2   : > { %2840 = vmatpush1.bf16.msra.mxu0 %v5643_v2 }
 0x1f3   : > { %2841 = vmatprep.subr.bf16.mxu0 %v5648_v3 }
 0x1f6   : > { %2842 = vmatpush1.bf16.msra.mxu0 %v5646_v4 }
 0x1f7   : > { %2864 = vmatprep.subr.bf16.mxu0 %v5651_v5 }
 0x1f9   : > { %2844 = vmatmul.mubr.bf16.vlgmr.msra.gmra.mrb[16].mxu0 %v6709_v28  ;;  %v5658_v28 = vld [vmem:[%s6464_s1 + $0x610] ss:$40 sps:$4 sm:$0xff]  }
 0x1fa   : > { %2865 = vmatpush1.bf16.msra.mxu0 %v5649_v6  ;;  %2853 = vmatprep.mubr.bf16.mxu0 %v5946_v9 }
 0x1fb   : > { %2866 = vmatprep.subr.bf16.mxu0 %v5654_v7  ;;  %v5676_v7 = vld [vmem:[%s6464_s1 + $0x7f0] ss:$40 sps:$4 sm:$0xff]  }
 0x1fe   : > { %2867 = vmatpush1.bf16.msra.mxu0 %v5652_v8 }
 0x1ff   : > { %2868 = vmatprep.subr.bf16.mxu0 %v5657_v10  ;;  %v5681_v10 = vld [vmem:[%s6464_s1 + $0x844] ss:$40 sps:$4 sm:$0xff]  }
 0x201   : > { %2854 = vmatmul.mubr.bf16.gmra.mrb[20].mxu0 %v5947_v17 }
 0x202   : > { %2869 = vmatpush1.bf16.msra.mxu0 %v5655_v12  ;;  %2896 = vmatprep.mubr.bf16.mxu0 %v5948_v18 }
 0x203   : > { %2870 = vmatprep.subr.bf16.mxu0 %v5660_v13 }
 0x206   : > { %2871 = vmatpush1.bf16.msra.mxu0 %v5658_v28 }
 0x207   : > { %2872 = vmatprep.subr.bf16.mxu0 %v5663_v19 }
 0x20a   : > { %2873 = vmatpush1.bf16.msra.mxu0 %v5661_v24 }
 0x20b   : > { %2874 = vmatprep.subr.bf16.mxu0 %v5666_v26 }
 0x20c   : > { %v2474_v33 = vpop.f32.mrb[0].mxu0 }
 0x20d   : > { %v6856_v34 = vadd.f32 %v2474_v33, %v700_v27  ;;  %v2476_v35 = vpop.f32.mrb[1].mxu0 }
 0x20e   : > { %v6858_v36 = vadd.f32 %v2476_v35, %v704_v29  ;;  %v2478_v15 = vpop.f32.mrb[2].mxu0  ;;  %2875 = vmatpush1.bf16.msra.mxu0 %v5664_v30  ;;  %v5684_v35 = vld [vmem:[%s6464_s1 + $0x894] ss:$40 sps:$4 sm:$0xff]  }
 0x20f   : > { %v4803_v40 = vmul.f32 -1.442695, %v6856_v34  ;;  %v6863_v41 = vadd.f32 %v2478_v15, %v700_v27  ;;  %v2480_v16 = vpop.f32.mrb[3].mxu0  ;;  %2876 = vmatprep.subr.bf16.mxu0 %v5669_v32  ;;  %v2580_v52 = vpop.f32.mrb[0].mxu1 }
 0x210   : > { %v4804_v42 = vmul.f32 -1.442695, %v6858_v36  ;;  %v6867_v43 = vadd.f32 %v2480_v16, %v704_v29  ;;  %v6883_v56 = vadd.f32 %v2580_v52, %v6873_v46  ;;  %v2582_v58 = vpop.f32.mrb[1].mxu1 }
 0x211   : > { %5777 = vpow2.f32 %v4803_v40  ;;  %v4813_v23 = vmul.f32 -1.442695, %v6863_v41  ;;  %v2584_v63 = vpop.f32.mrb[2].mxu1  ;;  %v6900_v8 = vadd.f32 %v2582_v58, %v6886_v57  ;;  %v5685_v58 = vld [vmem:[%s6464_s1 + $0x8e0] ss:$40 sps:$4 sm:$0xff]  }
 0x212   : > { %5779 = vpow2.f32 %v4804_v42  ;;  %v4814_v44 = vmul.f32 -1.442695, %v6867_v43  ;;  %2877 = vmatpush1.bf16.msra.mxu0 %v5667_v37  ;;  %v2586_v3 = vpop.f32.mrb[3].mxu1  ;;  %v4805_v5 = vmul.f32 -1.442695, %v6883_v56  ;;  %v6904_v11 = vadd.f32 %v2584_v63, %v6873_v46 }
 0x213   : > { %5781 = vpow2.f32 %v4813_v23  ;;  %2878 = vmatprep.subr.bf16.mxu0 %v5672_v38  ;;  %v6907_v17 = vadd.f32 %v2586_v3, %v6886_v57  ;;  %v5682_v38 = vld [vmem:[%s6464_s1 + $0x890] ss:$40 sps:$4 sm:$0xff]  }
 0x214   : > { %5783 = vpow2.f32 %v4814_v44  ;;  %v2484_v49 = vpop.f32.mrb[4].mxu0  ;;  %v4815_v15 = vmul.f32 -1.442695, %v6904_v11  ;;  %v5687_v44 = vld [vmem:[%s6464_s1 + $0x8e4] ss:$40 sps:$4 sm:$0xff]  }
 0x215   : > { %v6877_v50 = vadd.f32 %v2484_v49, %v700_v27  ;;  %v2486_v51 = vpop.f32.mrb[5].mxu0  ;;  %v4816_v39 = vmul.f32 -1.442695, %v6907_v17 }
 0x216   : > { %v6879_v53 = vadd.f32 %v2486_v51, %v704_v29  ;;  %v2488_v54 = vpop.f32.mrb[6].mxu0  ;;  %2879 = vmatpush1.bf16.msra.mxu0 %v5670_v45 }
 0x217   : > { %v4823_v59 = vmul.f32 -1.442695, %v6877_v50  ;;  %v6889_v60 = vadd.f32 %v2488_v54, %v700_v27  ;;  %v2490_v61 = vpop.f32.mrb[7].mxu0  ;;  %2880 = vmatprep.subr.bf16.mxu0 %v5675_v48  ;;  %v2590_v19 = vpop.f32.mrb[4].mxu1  ;;  %v5679_v27 = vld [vmem:[%s6464_s1 + $0x840] ss:$40 sps:$4 sm:$0xff]  }
 0x218   : > { %v4824_v1 = vmul.f32 -1.442695, %v6879_v53  ;;  %v6893_v2 = vadd.f32 %v2490_v61, %v704_v29  ;;  %v4806_v29 = vmul.f32 -1.442695, %v6900_v8  ;;  %v6912_v30 = vadd.f32 %v2590_v19, %v6873_v46  ;;  %v2592_v32 = vpop.f32.mrb[5].mxu1 }
 0x219   : > { %5785 = vpow2.f32 %v4823_v59  ;;  %v4833_v4 = vmul.f32 -1.442695, %v6889_v60  ;;  %v2594_v37 = vpop.f32.mrb[6].mxu1  ;;  %v6920_v23 = vadd.f32 %v2592_v32, %v6886_v57 }
 0x21a   : > { %5787 = vpow2.f32 %v4824_v1  ;;  %v4834_v6 = vmul.f32 -1.442695, %v6893_v2  ;;  %2881 = vmatpush1.bf16.msra.mxu0 %v5673_v55  ;;  %v2596_v40 = vpop.f32.mrb[7].mxu1  ;;  %v4825_v16 = vmul.f32 -1.442695, %v6912_v30  ;;  %v6924_v48 = vadd.f32 %v2594_v37, %v6873_v46 }
 0x21b   : > { %v5778_v9 = vpop.eup %5777  ;;  %5789 = vpow2.f32 %v4833_v4  ;;  %2882 = vmatprep.subr.bf16.mxu0 %v5678_v62  ;;  %v6927_v52 = vadd.f32 %v2596_v40, %v6886_v57  ;;  %v4826_v62 = vmul.f32 -1.442695, %v6920_v23  ;;  %v5690_v46 = vld [vmem:[%s6464_s1 + $0x934] ss:$40 sps:$4 sm:$0xff]  }
 0x21c   : > { %v5780_v12 = vpop.eup %5779  ;;  %v3037_v13 = vadd.f32 1.0, %v5778_v9  ;;  %5791 = vpow2.f32 %v4834_v6  ;;  %v4835_v57 = vmul.f32 -1.442695, %v6924_v48  ;;  %v5688_v6 = vld [vmem:[%s6464_s1 + $0x930] ss:$40 sps:$4 sm:$0xff]  }
 0x21d   : > { %v5782_v28 = vpop.eup %5781  ;;  %v3038_v18 = vadd.f32 1.0, %v5780_v12  ;;  %5793 = vpow2.f32 %v4805_v5  ;;  %v4836_v4 = vmul.f32 -1.442695, %v6927_v52  ;;  %v5695_v12 = vld [vmem:[%s6464_s1 + $0x984] ss:$40 sps:$4 sm:$0xff]  }
 0x21e   : > { %v5784_v24 = vpop.eup %5783  ;;  %5795 = vrcp.f32 %v3037_v13  ;;  %v3047_v26 = vadd.f32 1.0, %v5782_v28  ;;  %2883 = vmatpush1.bf16.msra.mxu0 %v5676_v7 }
 0x21f   : > { %5797 = vrcp.f32 %v3038_v18  ;;  %v3048_v33 = vadd.f32 1.0, %v5784_v24  ;;  %2884 = vmatprep.subr.bf16.mxu0 %v5681_v10 }
 0x220   : > { %5799 = vrcp.f32 %v3047_v26 }
 0x221   : > { %5801 = vrcp.f32 %v3048_v33 }
 0x222   : > { %2885 = vmatpush1.bf16.msra.mxu0 %v5679_v27  ;;  %5803 = vpow2.f32 %v4806_v29 }
 0x223   : > { %v5786_v42 = vpop.eup %5785  ;;  %2886 = vmatprep.subr.bf16.mxu0 %v5684_v35  ;;  %5805 = vpow2.f32 %v4815_v15 }
 0x224   : > { %v5788_v45 = vpop.eup %5787  ;;  %v3057_v47 = vadd.f32 1.0, %v5786_v42  ;;  %5807 = vpow2.f32 %v4816_v39  ;;  %v5698_v42 = vld [vmem:[%s6464_s1 + $0x9d0] ss:$40 sps:$4 sm:$0xff]  }
 0x225   : > { %v5790_v49 = vpop.eup %5789  ;;  %v3058_v51 = vadd.f32 1.0, %v5788_v45  ;;  %5809 = vpow2.f32 %v4825_v16 }
 0x226   : > { %v5792_v54 = vpop.eup %5791  ;;  %5811 = vrcp.f32 %v3057_v47  ;;  %v3067_v55 = vadd.f32 1.0, %v5790_v49  ;;  %2887 = vmatpush1.bf16.msra.mxu0 %v5682_v38 }
 0x227   : > { %v5794_v59 = vpop.eup %5793  ;;  %5813 = vrcp.f32 %v3058_v51  ;;  %v3068_v61 = vadd.f32 1.0, %v5792_v54  ;;  %2888 = vmatprep.subr.bf16.mxu0 %v5687_v44 }
 0x228   : > { %v5796_v63 = vpop.eup %5795  ;;  %5815 = vrcp.f32 %v3067_v55  ;;  %v3039_v1 = vadd.f32 1.0, %v5794_v59 }
 0x229   : > { %v5798_v3 = vpop.eup %5797  ;;  %5817 = vrcp.f32 %v3068_v61  ;;  %v3157_v9 = vmul.f32 %v5796_v63, %v6856_v34 }
 0x22a   : > { %v5800_v5 = vpop.eup %5799  ;;  %5819 = vrcp.f32 %v3039_v1  ;;  %2889 = vmatpush1.bf16.msra.mxu0 %v5685_v58  ;;  %v3158_v28 = vmul.f32 %v5798_v3, %v6858_v36  ;;  %v5700_v36 = vld [vmem:[%s6464_s1 + $0x9d4] ss:$40 sps:$4 sm:$0xff]  }
 0x22b   : > { %v5802_v7 = vpop.eup %5801  ;;  %v3167_v10 = vmul.f32 %v5800_v5, %v6863_v41  ;;  %5821 = vpow2.f32 %v4826_v62  ;;  %2890 = vmatprep.subr.bf16.mxu0 %v5690_v46  ;;  %v5693_v41 = vld [vmem:[%s6464_s1 + $0x980] ss:$40 sps:$4 sm:$0xff]  }
 0x22c   : > { %v5804_v13 = vpop.eup %5803  ;;  %v3168_v18 = vmul.f32 %v5802_v7, %v6867_v43  ;;  %5823 = vpow2.f32 %v4835_v57 }
 0x22d   : > { %v5806_v19 = vpop.eup %5805  ;;  %v3197_v24 = vadd.f32 %v3167_v10, %v3157_v9  ;;  %v3040_v26 = vadd.f32 1.0, %v5804_v13  ;;  %5825 = vpow2.f32 %v4836_v4 }
 0x22e   : > { %v5808_v27 = vpop.eup %5807  ;;  %v3204_v29 = vadd.f32 %v3168_v18, %v3158_v28  ;;  %v3049_v34 = vadd.f32 1.0, %v5806_v19  ;;  %2891 = vmatpush1.bf16.msra.mxu0 %v5688_v6 }
 0x22f   : > { %v5810_v32 = vpop.eup %5809  ;;  %v3198_v33 = vrot.slane %v3197_v24, 4  ;;  %5827 = vrcp.f32 %v3040_v26  ;;  %v3050_v35 = vadd.f32 1.0, %v5808_v27  ;;  %2892 = vmatprep.subr.bf16.mxu0 %v5695_v12 }
 0x230   : > { %v5812_v15 = vpop.eup %5811  ;;  %v3205_v43 = vrot.slane %v3204_v29, 4  ;;  %5829 = vrcp.f32 %v3049_v34  ;;  %v3059_v40 = vadd.f32 1.0, %v5810_v32 }
 0x231   : > { %v5814_v37 = vpop.eup %5813  ;;  %v3199_v39 = vadd.f32 %v3198_v33, %v3197_v24  ;;  %5831 = vrcp.f32 %v3050_v35  ;;  %v3177_v47 = vmul.f32 %v5812_v15, %v6877_v50 }
 0x232   : > { %v5816_v16 = vpop.eup %5815  ;;  %v3206_v38 = vadd.f32 %v3205_v43, %v3204_v29  ;;  %2893 = vmatpush1.bf16.msra.mxu0 %v5693_v41  ;;  %v3178_v55 = vmul.f32 %v5814_v37, %v6879_v53  ;;  %5833 = vrcp.f32 %v3059_v40 }
 0x233   : > { %v5818_v44 = vpop.eup %5817  ;;  %v3200_v45 = vrot.slane %v3199_v39, 2  ;;  %v3187_v49 = vmul.f32 %v5816_v16, %v6889_v60  ;;  %2894 = vmatprep.subr.bf16.mxu0 %v5700_v36 }
 0x234   : > { %v5820_v51 = vpop.eup %5819  ;;  %v3207_v54 = vrot.slane %v3206_v38, 2  ;;  %v3188_v58 = vmul.f32 %v5818_v44, %v6893_v2 }
 0x235   : > { %v5822_v59 = vpop.eup %5821  ;;  %v3201_v61 = vadd.f32 %v3200_v45, %v3199_v39  ;;  %v3267_v62 = vadd.f32 %v3187_v49, %v3177_v47  ;;  %v3159_v2 = vmul.f32 %v5820_v51, %v6883_v56 }
 0x236   : > { %v5824_v46 = vpop.eup %5823  ;;  %v3208_v63 = vadd.f32 %v3207_v54, %v3206_v38  ;;  %v3274_v1 = vadd.f32 %v3188_v58, %v3178_v55  ;;  %v3060_v57 = vadd.f32 1.0, %v5822_v59  ;;  %2895 = vmatpush1.bf16.msra.mxu0 %v5698_v42 }
 0x237   : > { %v5826_v3 = vpop.eup %5825  ;;  %v3202_v50 = vrot.slane %v3201_v61, 1  ;;  %v3268_v4 = vrot.slane %v3267_v62, 4  ;;  %v3069_v60 = vadd.f32 1.0, %v5824_v46 }
 0x238   : > { %v3209_v5 = vrot.slane %v3208_v63, 1  ;;  %v3275_v6 = vrot.slane %v3274_v1, 4  ;;  %5835 = vrcp.f32 %v3060_v57  ;;  %v3070_v7 = vadd.f32 1.0, %v5826_v3 }
 0x239   : > { %v5828_v53 = vpop.eup %5827  ;;  %v3269_v9 = vadd.f32 %v3268_v4, %v3267_v62  ;;  %5837 = vrcp.f32 %v3069_v60  ;;  %2897 = vmatmul.mubr.bf16.vlgmr.msra.gmra.mrb[16].mxu0 %v6771_v20  ;;  %v3203_v18 = vadd.f32 %v3202_v50, %v3201_v61 }
 0x23a   : > { %v5830_v10 = vpop.eup %5829  ;;  %v3276_v12 = vadd.f32 %v3275_v6, %v3274_v1  ;;  %v3160_v13 = vmul.f32 %v5828_v53, %v6900_v8  ;;  %5839 = vrcp.f32 %v3070_v7  ;;  %2906 = vmatprep.mubr.bf16.mxu0 %v6775_v22  ;;  %v3210_v29 = vadd.f32 %v3209_v5, %v3208_v63 }
 0x23b   : > { %v5832_v28 = vpop.eup %5831  ;;  %v3270_v19 = vrot.slane %v3269_v9, 2  ;;  %v3169_v24 = vmul.f32 %v5830_v10, %v6904_v11  ;;  %v3337_v33 = vmul.f32 0.0625, %v3203_v18 }
 0x23c   : > { %v3277_v26 = vrot.slane %v3276_v12, 2  ;;  %v3170_v27 = vmul.f32 %v5832_v28, %v6907_v17  ;;  %v5834_v32 = vpop.eup %5833  ;;  %v3338_v22 = vmul.f32 0.0625, %v3210_v29 }
 0x23d   : > { %v3271_v56 = vadd.f32 %v3270_v19, %v3269_v9  ;;  %v3211_v34 = vadd.f32 %v3169_v24, %v3159_v2  ;;  %v3179_v17 = vmul.f32 %v5834_v32, %v6912_v30  ;;  %v3357_v38 = vpack.c.bf16 %v3337_v33, %v3337_v33  ;;  %v5714_v9 = vld [vmem:[%s6474_s27 + $0x80] sm:$0xff]   ;;  %v5718_v32 = vld [vmem:[%s6474_s27 + $0x90] sm:$0xff]  }
 0x23e   : > { %v3278_v41 = vadd.f32 %v3277_v26, %v3276_v12  ;;  %v3218_v20 = vadd.f32 %v3170_v27, %v3160_v13  ;;  %v3358_v55 = vpack.c.bf16 %v3338_v22, %v3338_v22  ;;  %v5715_v13 = vld [vmem:[%s6474_s27 + $0xc8] sm:$0xff]  }
 0x23f   : > { %v3272_v35 = vrot.slane %v3271_v56, 1  ;;  %v3212_v8 = vrot.slane %v3211_v34, 4  ;;  %v3564_v46 = vunpack.c.l.b16 %v3357_v38  ;;  %v5716_v26 = vld [vmem:[%s6474_s27 + $0x88] sm:$0xff]  }
 0x240   : > { %v3279_v36 = vrot.slane %v3278_v41, 1  ;;  %v3219_v15 = vrot.slane %v3218_v20, 4  ;;  %v3565_v50 = vunpack.c.l.b16 %v3358_v55  ;;  %v5727_v55 = vld [vmem:[%s6474_s27 + $0xf8] sm:$0xff]  }
 0x241   : > { %v3273_v43 = vadd.f32 %v3272_v35, %v3271_v56  ;;  %v3213_v37 = vadd.f32 %v3212_v8, %v3211_v34  ;;  %2907 = vmatmul.mubr.bf16.gmra.mrb[20].mxu0 %v6785_v31  ;;  %v5717_v56 = vld [vmem:[%s6474_s27 + $0xd0] sm:$0xff]  }
 0x242   : > { %v5836_v11 = vpop.eup %5835  ;;  %v3220_v39 = vadd.f32 %v3219_v15, %v3218_v20  ;;  %v3280_v40 = vadd.f32 %v3279_v36, %v3278_v41  ;;  %v5719_v36 = vld [vmem:[%s6474_s27 + $0xd8] sm:$0xff]  }
 0x243   : > { %v5838_v16 = vpop.eup %5837  ;;  %v3347_v42 = vmul.f32 0.0625, %v3273_v43  ;;  %v3214_v44 = vrot.slane %v3213_v37, 2  ;;  %v3180_v45 = vmul.f32 %v5836_v11, %v6920_v23 }
 0x244   : > { %v5840_v47 = vpop.eup %5839  ;;  %v3221_v49 = vrot.slane %v3220_v39, 2  ;;  %v3189_v51 = vmul.f32 %v5838_v16, %v6924_v48  ;;  %v3348_v54 = vmul.f32 0.0625, %v3280_v40  ;;  %v5721_v40 = vld [vmem:[%s6474_s27 + $0xe0] sm:$0xff]  }
 0x245   : > { %v3367_v58 = vpack.c.bf16 %v3347_v42, %v3347_v42  ;;  %v3215_v59 = vadd.f32 %v3214_v44, %v3213_v37  ;;  %v3190_v31 = vmul.f32 %v5840_v47, %v6927_v52  ;;  %v5720_v37 = vld [vmem:[%s6474_s27 + $0x98] sm:$0xff]   ;;  %v5722_v42 = vld [vmem:[%s6474_s27 + $0xa0] sm:$0xff]  }
 0x246   : > { %v3222_v61 = vadd.f32 %v3221_v49, %v3220_v39  ;;  %v3281_v62 = vadd.f32 %v3189_v51, %v3179_v17  ;;  %v3368_v30 = vpack.c.bf16 %v3348_v54, %v3348_v54  ;;  %v5724_v49 = vld [vmem:[%s6474_s27 + $0xa8] sm:$0xff]   ;;  %v5725_v51 = vld [vmem:[%s6474_s27 + $0xf0] sm:$0xff]  }
 0x247   : > { %v3574_v63 = vunpack.c.l.b16 %v3367_v58  ;;  %v3216_v1 = vrot.slane %v3215_v59, 1  ;;  %v3288_v57 = vadd.f32 %v3190_v31, %v3180_v45  ;;  %v5723_v45 = vld [vmem:[%s6474_s27 + $0xe8] sm:$0xff]   ;;  %v5726_v54 = vld [vmem:[%s6474_s27 + $0xb0] sm:$0xff]   ;;  %v5728_v58 = vld [vmem:[%s6474_s27 + $0xb8] sm:$0xff]  }
 0x248   : > { %v3223_v23 = vrot.slane %v3222_v61, 1  ;;  %v3282_v3 = vrot.slane %v3281_v62, 4  ;;  %v3575_v48 = vunpack.c.l.b16 %v3368_v30  ;;  %v5730_v31 = vld [vmem:[%s6474_s27 + $0x100] sm:$0xff]   ;;  %v5732_v30 = vld [vmem:[%s6474_s27 + $0x108] sm:$0xff]  }
 0x249   : > { %v3289_v4 = vrot.slane %v3288_v57, 4  ;;  %v3585_v60 = vsel %vm3584_vm0, %v3574_v63, %v3564_v46  ;;  %v3217_v5 = vadd.f32 %v3216_v1, %v3215_v59  ;;  %v5729_v59 = vld [vmem:[%s6474_s27 + $0x140] sm:$0xff]   ;;  %v5733_v46 = vld [vmem:[%s6474_s27 + $0x150] sm:$0xff]   ;;  %v5735_v1 = vld [vmem:[%s6474_s27 + $0x158] sm:$0xff]  }
 0x24a   : > { %v3283_v6 = vadd.f32 %v3282_v3, %v3281_v62  ;;  %v3586_v52 = vsel %vm3584_vm0, %v3575_v48, %v3565_v50  ;;  %v3224_v2 = vadd.f32 %v3223_v23, %v3222_v61  ;;  %v3595_v12 = vpack.c.b16 %v3585_v60, %v3585_v60  ;;  %v5731_v62 = vld [vmem:[%s6474_s27 + $0x148] sm:$0xff]   ;;  %v5734_v63 = vld [vmem:[%s6474_s27 + $0x110] sm:$0xff]   ;;  %v5737_v23 = vld [vmem:[%s6474_s27 + $0x160] sm:$0xff]  }
 0x24b   : > { %v3290_v7 = vadd.f32 %v3289_v4, %v3288_v57  ;;  %v3596_v53 = vpack.c.b16 %v3586_v52, %v3586_v52  ;;  %v3339_v18 = vmul.f32 0.0625, %v3217_v5  ;;  %v5736_v57 = vld [vmem:[%s6474_s27 + $0x118] sm:$0xff]   ;;  %v5738_v3 = vld [vmem:[%s6474_s27 + $0x120] sm:$0xff]   ;;  %v5739_v50 = vld [vmem:[%s6474_s27 + $0x168] sm:$0xff]   ;;  %v719_v52 = vsub.s32 5, %v6837_v14 }
 0x24c   : > { %v3284_v10 = vrot.slane %v3283_v6, 2  ;;  %v3340_v27 = vmul.f32 0.0625, %v3224_v2  ;;  %v5740_v48 = vld [vmem:[%s6474_s27 + $0x128] sm:$0xff]   ;;  %v5741_v4 = vld [vmem:[%s6474_s27 + $0x170] sm:$0xff]   ;;  %v5743_v5 = vld [vmem:[%s6474_s27 + $0x178] sm:$0xff]  }
 0x24d   : > { %v3291_v28 = vrot.slane %v3290_v7, 2  ;;  %4127 = vmatprep.mubr.bf16.mxu1 %v3596_v53  ;;  %v3359_v41 = vpack.c.bf16 %v3339_v18, %v3339_v18  ;;  %v5742_v60 = vld [vmem:[%s6474_s27 + $0x130] sm:$0xff]   ;;  %v5745_v53 = vld [vmem:[%s6474_s27 + $0x1c0] sm:$0xff]   ;;  %v720_v2 = vrot.slane %v6844_v0, %v719_v52 }
 0x24e   : > { %v3285_v19 = vadd.f32 %v3284_v10, %v3283_v6  ;;  %4128 = vmatmul.mubr.bf16.vlgmr.msra.gmra.mrb[16].mxu1 %v3595_v12  ;;  %v3360_v35 = vpack.c.bf16 %v3340_v27, %v3340_v27  ;;  %v715_v6 = vsub.s32 4, %v6837_v14 }
 0x24f   : > { %v3292_v24 = vadd.f32 %v3291_v28, %v3290_v7  ;;  %4951 = vmatpush3.bf16.msra.mxu1 %v5714_v9  ;;  %v3566_v22 = vunpack.c.l.b16 %v3359_v41  ;;  %v5744_v7 = vld [vmem:[%s6474_s27 + $0x138] sm:$0xff]  }
 0x250   : > { %v3286_v29 = vrot.slane %v3285_v19, 1  ;;  %4952 = vmatprep.subr.bf16.mxu1 %v5715_v13  ;;  %v3567_v39 = vunpack.c.l.b16 %v3360_v35  ;;  %v716_v9 = vrot.slane %v6844_v0, %v715_v6 }
 0x251   : > { %v3293_v34 = vrot.slane %v3292_v24, 1 }
 0x252   : > { %v3287_v20 = vadd.f32 %v3286_v29, %v3285_v19  ;;  %v723_v19 = vsub.s32 6, %v6837_v14 }
 0x253   : > { %4953 = vmatpush3.bf16.msra.mxu1 %v5716_v26  ;;  %v3294_v33 = vadd.f32 %v3293_v34, %v3292_v24 }
 0x254   : > { %v3349_v8 = vmul.f32 0.0625, %v3287_v20  ;;  %4954 = vmatprep.subr.bf16.mxu1 %v5717_v56  ;;  %v724_v20 = vrot.slane %v6844_v0, %v723_v19 }
 0x255   : > { %v3350_v15 = vmul.f32 0.0625, %v3294_v33 }
 0x256   : > { %v3369_v43 = vpack.c.bf16 %v3349_v8, %v3349_v8 }
 0x257   : > { %4955 = vmatpush3.bf16.msra.mxu1 %v5718_v32  ;;  %v3370_v11 = vpack.c.bf16 %v3350_v15, %v3350_v15  ;;  %v727_v32 = vsub.s32 7, %v6837_v14 }
 0x258   : > { %v3576_v17 = vunpack.c.l.b16 %v3369_v43  ;;  %4956 = vmatprep.subr.bf16.mxu1 %v5719_v36 }
 0x259   : > { %v3577_v16 = vunpack.c.l.b16 %v3370_v11 }
 0x25a   : > { %v3587_v38 = vsel %vm3584_vm0, %v3576_v17, %v3566_v22 }
 0x25b   : > { %4957 = vmatpush3.bf16.msra.mxu1 %v5720_v37  ;;  %v3588_v44 = vsel %vm3584_vm0, %v3577_v16, %v3567_v39  ;;  %v3597_v61 = vpack.c.b16 %v3587_v38, %v3587_v38  ;;  %v728_v37 = vrot.slane %v6844_v0, %v727_v32 }
 0x25c   : > { %4958 = vmatprep.subr.bf16.mxu1 %v5721_v40  ;;  %v3598_v47 = vpack.c.b16 %v3588_v44, %v3588_v44 }
 0x25e   : > { %4167 = vmatprep.mubr.bf16.mxu1 %v3598_v47 }
 0x25f   : > { %4959 = vmatpush3.bf16.msra.mxu1 %v5722_v42 }
 0x260   : > { %4960 = vmatprep.subr.bf16.mxu1 %v5723_v45 }
 0x263   : > { %4961 = vmatpush3.bf16.msra.mxu1 %v5724_v49 }
 0x264   : > { %4962 = vmatprep.subr.bf16.mxu1 %v5725_v51 }
 0x267   : > { %4963 = vmatpush3.bf16.msra.mxu1 %v5726_v54 }
 0x268   : > { %4964 = vmatprep.subr.bf16.mxu1 %v5727_v55 }
 0x26b   : > { %4965 = vmatpush3.bf16.msra.mxu1 %v5728_v58 }
 0x26c   : > { %4972 = vmatprep.subr.bf16.mxu1 %v5729_v59 }
 0x26e   : > { %4168 = vmatmul.mubr.bf16.vlgmr.msra.gmra.mrb[20].mxu1 %v3597_v61 }
 0x26f   : > { %4973 = vmatpush3.bf16.msra.mxu1 %v5730_v31 }
 0x270   : > { %4974 = vmatprep.subr.bf16.mxu1 %v5731_v62 }
 0x273   : > { %4975 = vmatpush3.bf16.msra.mxu1 %v5732_v30 }
 0x274   : > { %4976 = vmatprep.subr.bf16.mxu1 %v5733_v46 }
 0x277   : > { %4977 = vmatpush3.bf16.msra.mxu1 %v5734_v63 }
 0x278   : > { %4978 = vmatprep.subr.bf16.mxu1 %v5735_v1 }
 0x27b   : > { %4979 = vmatpush3.bf16.msra.mxu1 %v5736_v57 }
 0x27c   : > { %4980 = vmatprep.subr.bf16.mxu1 %v5737_v23 }
 0x27f   : > { %4981 = vmatpush3.bf16.msra.mxu1 %v5738_v3 }
 0x280   : > { %4982 = vmatprep.subr.bf16.mxu1 %v5739_v50 }
 0x283   : > { %4983 = vmatpush3.bf16.msra.mxu1 %v5740_v48 }
 0x284   : > { %4984 = vmatprep.subr.bf16.mxu1 %v5741_v4 }
 0x287   : > { %4985 = vmatpush3.bf16.msra.mxu1 %v5742_v60 }
 0x288   : > { %4986 = vmatprep.subr.bf16.mxu1 %v5743_v5 }
 0x28b   : > { %4987 = vmatpush3.bf16.msra.mxu1 %v5744_v7 }
 0x28c   : > { %v2686_v10 = vpop.f32.mrb[8].mxu0  ;;  %4994 = vmatprep.subr.bf16.mxu1 %v5745_v53 }
 0x28d   : > { %v6998_v12 = vadd.f32 %v2686_v10, %v716_v9  ;;  %v2688_v13 = vpop.f32.mrb[9].mxu0 }
 0x28e   : > { %v7000_v28 = vadd.f32 %v2688_v13, %v720_v2  ;;  %v2690_v18 = vpop.f32.mrb[10].mxu0 }
 0x28f   : > { %v4807_v24 = vmul.f32 -1.442695, %v6998_v12  ;;  %v7004_v26 = vadd.f32 %v2690_v18, %v716_v9  ;;  %v2692_v27 = vpop.f32.mrb[11].mxu0  ;;  %v2792_v36 = vpop.f32.mrb[8].mxu1 }
 0x290   : > { %v4808_v29 = vmul.f32 -1.442695, %v7000_v28  ;;  %v7007_v56 = vadd.f32 %v2692_v27, %v720_v2  ;;  %v7017_v43 = vadd.f32 %v2792_v36, %v724_v20  ;;  %v2794_v11 = vpop.f32.mrb[9].mxu1 }
 0x291   : > { %5841 = vpow2.f32 %v4807_v24  ;;  %v4817_v34 = vmul.f32 -1.442695, %v7004_v26  ;;  %v2796_v16 = vpop.f32.mrb[10].mxu1  ;;  %v7029_v49 = vadd.f32 %v2794_v11, %v728_v37 }
 0x292   : > { %5843 = vpow2.f32 %v4808_v29  ;;  %v4818_v41 = vmul.f32 -1.442695, %v7007_v56  ;;  %v2798_v44 = vpop.f32.mrb[11].mxu1  ;;  %v4809_v47 = vmul.f32 -1.442695, %v7017_v43  ;;  %v7031_v54 = vadd.f32 %v2796_v16, %v724_v20 }
 0x293   : > { %5845 = vpow2.f32 %v4817_v34  ;;  %v7033_v59 = vadd.f32 %v2798_v44, %v728_v37  ;;  %v4810_v63 = vmul.f32 -1.442695, %v7029_v49  ;;  %v5761_v44 = vld [vmem:[%s6474_s27 + $0x240] sm:$0xff]  }
 0x294   : > { %5847 = vpow2.f32 %v4818_v41  ;;  %v2696_v33 = vpop.f32.mrb[12].mxu0  ;;  %v4819_v3 = vmul.f32 -1.442695, %v7031_v54  ;;  %5016 = vmatprep.subr.bf16.mxu0 %v5761_v44 }
 0x295   : > { %v7013_v35 = vadd.f32 %v2696_v33, %v716_v9  ;;  %v2698_v8 = vpop.f32.mrb[13].mxu0  ;;  %v4820_v48 = vmul.f32 -1.442695, %v7033_v59 }
 0x296   : > { %v7015_v15 = vadd.f32 %v2698_v8, %v720_v2  ;;  %v2700_v22 = vpop.f32.mrb[14].mxu0 }
 0x297   : > { %v4827_v39 = vmul.f32 -1.442695, %v7013_v35  ;;  %v7021_v17 = vadd.f32 %v2700_v22, %v716_v9  ;;  %v2702_v40 = vpop.f32.mrb[15].mxu0  ;;  %v2802_v62 = vpop.f32.mrb[12].mxu1 }
 0x298   : > { %v4828_v38 = vmul.f32 -1.442695, %v7015_v15  ;;  %v7024_v42 = vadd.f32 %v2702_v40, %v720_v2  ;;  %v7036_v1 = vadd.f32 %v2802_v62, %v724_v20  ;;  %v2804_v57 = vpop.f32.mrb[13].mxu1  ;;  %v5763_v62 = vld [vmem:[%s6474_s27 + $0x248] sm:$0xff]  }
 0x299   : > { %5849 = vpow2.f32 %v4827_v39  ;;  %v4837_v45 = vmul.f32 -1.442695, %v7021_v17  ;;  %v2806_v50 = vpop.f32.mrb[14].mxu1  ;;  %v7041_v6 = vadd.f32 %v2804_v57, %v728_v37 }
 0x29a   : > { %5851 = vpow2.f32 %v4828_v38  ;;  %v4838_v0 = vmul.f32 -1.442695, %v7024_v42  ;;  %v2808_v4 = vpop.f32.mrb[15].mxu1  ;;  %v4829_v60 = vmul.f32 -1.442695, %v7036_v1  ;;  %v7043_v53 = vadd.f32 %v2806_v50, %v724_v20 }
 0x29b   : > { %v5842_v51 = vpop.eup %5841  ;;  %5853 = vpow2.f32 %v4837_v45  ;;  %v7045_v10 = vadd.f32 %v2808_v4, %v728_v37  ;;  %v4830_v27 = vmul.f32 -1.442695, %v7041_v6 }
 0x29c   : > { %v5844_v55 = vpop.eup %5843  ;;  %v3041_v58 = vadd.f32 1.0, %v5842_v51  ;;  %5855 = vpow2.f32 %v4838_v0  ;;  %v4839_v41 = vmul.f32 -1.442695, %v7043_v53  ;;  %v5762_v51 = vld [vmem:[%s6474_s27 + $0x200] sm:$0xff]  }
 0x29d   : > { %v5846_v31 = vpop.eup %5845  ;;  %v3042_v61 = vadd.f32 1.0, %v5844_v55  ;;  %5857 = vpow2.f32 %v4809_v47  ;;  %v4840_v32 = vmul.f32 -1.442695, %v7045_v10  ;;  %5017 = vmatpush3.bf16.msra.mxu0 %v5762_v51  ;;  %v5769_v51 = vld [vmem:[%s6474_s27 + $0x260] sm:$0xff]  }
 0x29e   : > { %v5848_v30 = vpop.eup %5847  ;;  %5859 = vrcp.f32 %v3041_v58  ;;  %v3051_v46 = vadd.f32 1.0, %v5846_v31  ;;  %5018 = vmatprep.subr.bf16.mxu0 %v5763_v62 }
 0x29f   : > { %5861 = vrcp.f32 %v3042_v61  ;;  %v3052_v23 = vadd.f32 1.0, %v5848_v30 }
 0x2a0   : > { %5863 = vrcp.f32 %v3051_v46 }
 0x2a1   : > { %5865 = vrcp.f32 %v3052_v23 }
 0x2a2   : > { %5867 = vpow2.f32 %v4810_v63  ;;  %v5764_v63 = vld [vmem:[%s6474_s27 + $0x208] sm:$0xff]  }
 0x2a3   : > { %v5850_v5 = vpop.eup %5849  ;;  %5869 = vpow2.f32 %v4819_v3  ;;  %5019 = vmatpush3.bf16.msra.mxu0 %v5764_v63 }
 0x2a4   : > { %v5852_v52 = vpop.eup %5851  ;;  %v3061_v7 = vadd.f32 1.0, %v5850_v5  ;;  %5871 = vpow2.f32 %v4820_v48 }
 0x2a5   : > { %v5854_v9 = vpop.eup %5853  ;;  %v3062_v2 = vadd.f32 1.0, %v5852_v52  ;;  %5873 = vpow2.f32 %v4829_v60 }
 0x2a6   : > { %v5856_v13 = vpop.eup %5855  ;;  %5875 = vrcp.f32 %v3061_v7  ;;  %v3071_v18 = vadd.f32 1.0, %v5854_v9 }
 0x2a7   : > { %v5858_v19 = vpop.eup %5857  ;;  %5877 = vrcp.f32 %v3062_v2  ;;  %v3072_v24 = vadd.f32 1.0, %v5856_v13  ;;  %v5765_v2 = vld [vmem:[%s6474_s27 + $0x250] sm:$0xff]  }
 0x2a8   : > { %v5860_v29 = vpop.eup %5859  ;;  %5879 = vrcp.f32 %v3071_v18  ;;  %v3043_v34 = vadd.f32 1.0, %v5858_v19  ;;  %5020 = vmatprep.subr.bf16.mxu0 %v5765_v2 }
 0x2a9   : > { %v5862_v20 = vpop.eup %5861  ;;  %5881 = vrcp.f32 %v3072_v24  ;;  %v3161_v36 = vmul.f32 %v5860_v29, %v6998_v12 }
 0x2aa   : > { %v5864_v33 = vpop.eup %5863  ;;  %5883 = vrcp.f32 %v3043_v34  ;;  %v3162_v11 = vmul.f32 %v5862_v20, %v7000_v28 }
 0x2ab   : > { %v5866_v8 = vpop.eup %5865  ;;  %v3171_v22 = vmul.f32 %v5864_v33, %v7004_v26  ;;  %5885 = vpow2.f32 %v4830_v27 }
 0x2ac   : > { %v5868_v37 = vpop.eup %5867  ;;  %v3172_v39 = vmul.f32 %v5866_v8, %v7007_v56  ;;  %5887 = vpow2.f32 %v4839_v41  ;;  %v5767_v8 = vld [vmem:[%s6474_s27 + $0x258] sm:$0xff]  }
 0x2ad   : > { %v5870_v40 = vpop.eup %5869  ;;  %v3225_v16 = vadd.f32 %v3171_v22, %v3161_v36  ;;  %v3044_v38 = vadd.f32 1.0, %v5868_v37  ;;  %5889 = vpow2.f32 %v4840_v32 }
 0x2ae   : > { %v5872_v45 = vpop.eup %5871  ;;  %v3232_v47 = vadd.f32 %v3172_v39, %v3162_v11  ;;  %v3053_v0 = vadd.f32 1.0, %v5870_v40  ;;  %v5768_v11 = vld [vmem:[%s6474_s27 + $0x218] sm:$0xff]  }
 0x2af   : > { %v5874_v12 = vpop.eup %5873  ;;  %v3226_v26 = vrot.slane %v3225_v16, 4  ;;  %5891 = vrcp.f32 %v3044_v38  ;;  %v3054_v55 = vadd.f32 1.0, %v5872_v45 }
 0x2b0   : > { %v5876_v28 = vpop.eup %5875  ;;  %v3233_v58 = vrot.slane %v3232_v47, 4  ;;  %5893 = vrcp.f32 %v3053_v0  ;;  %v3063_v61 = vadd.f32 1.0, %v5874_v12 }
 0x2b1   : > { %v5878_v56 = vpop.eup %5877  ;;  %v3227_v31 = vadd.f32 %v3226_v26, %v3225_v16  ;;  %5895 = vrcp.f32 %v3054_v55  ;;  %v3181_v3 = vmul.f32 %v5876_v28, %v7013_v35  ;;  %v5770_v26 = vld [vmem:[%s6474_s27 + $0x220] sm:$0xff]  }
 0x2b2   : > { %v5880_v30 = vpop.eup %5879  ;;  %v3234_v46 = vadd.f32 %v3233_v58, %v3232_v47  ;;  %v3182_v60 = vmul.f32 %v5878_v56, %v7015_v15  ;;  %5897 = vrcp.f32 %v3063_v61 }
 0x2b3   : > { %v5882_v57 = vpop.eup %5881  ;;  %v3228_v23 = vrot.slane %v3227_v31, 2  ;;  %v3191_v50 = vmul.f32 %v5880_v30, %v7021_v17  ;;  %v5766_v17 = vld [vmem:[%s6474_s27 + $0x210] sm:$0xff]   ;;  %v5771_v30 = vld [vmem:[%s6474_s27 + $0x268] sm:$0xff]  }
 0x2b4   : > { %v5884_v48 = vpop.eup %5883  ;;  %v3235_v4 = vrot.slane %v3234_v46, 2  ;;  %v3192_v5 = vmul.f32 %v5882_v57, %v7024_v42  ;;  %5021 = vmatpush3.bf16.msra.mxu0 %v5766_v17 }
 0x2b5   : > { %v5886_v52 = vpop.eup %5885  ;;  %v3229_v7 = vadd.f32 %v3228_v23, %v3227_v31  ;;  %v3295_v9 = vadd.f32 %v3191_v50, %v3181_v3  ;;  %v3163_v33 = vmul.f32 %v5884_v48, %v7017_v43  ;;  %5022 = vmatprep.subr.bf16.mxu0 %v5767_v8  ;;  %v5772_v3 = vld [vmem:[%s6474_s27 + $0x228] sm:$0xff]  }
 0x2b6   : > { %v5888_v13 = vpop.eup %5887  ;;  %v3236_v18 = vadd.f32 %v3235_v4, %v3234_v46  ;;  %v3302_v19 = vadd.f32 %v3192_v5, %v3182_v60  ;;  %v3064_v35 = vadd.f32 1.0, %v5886_v52 }
 0x2b7   : > { %v5890_v24 = vpop.eup %5889  ;;  %v3230_v27 = vrot.slane %v3229_v7, 1  ;;  %v3296_v29 = vrot.slane %v3295_v9, 4  ;;  %v3073_v34 = vadd.f32 1.0, %v5888_v13 }
 0x2b8   : > { %v3237_v15 = vrot.slane %v3236_v18, 1  ;;  %v3303_v42 = vrot.slane %v3302_v19, 4  ;;  %5899 = vrcp.f32 %v3064_v35  ;;  %v3074_v41 = vadd.f32 1.0, %v5890_v24  ;;  %5023 = vmatpush3.bf16.msra.mxu0 %v5768_v11  ;;  %v5773_v35 = vld [vmem:[%s6474_s27 + $0x270] sm:$0xff]  }
 0x2b9   : > { %v5892_v20 = vpop.eup %5891  ;;  %v3297_v32 = vadd.f32 %v3296_v29, %v3295_v9  ;;  %5901 = vrcp.f32 %v3073_v34  ;;  %v3231_v40 = vadd.f32 %v3230_v27, %v3229_v7  ;;  %5024 = vmatprep.subr.bf16.mxu0 %v5769_v51  ;;  %v5774_v29 = vld [vmem:[%s6474_s27 + $0x230] sm:$0xff]  }
 0x2ba   : > { %v5894_v36 = vpop.eup %5893  ;;  %v3304_v22 = vadd.f32 %v3303_v42, %v3302_v19  ;;  %v3164_v37 = vmul.f32 %v5892_v20, %v7029_v49  ;;  %5903 = vrcp.f32 %v3074_v41  ;;  %v3238_v43 = vadd.f32 %v3237_v15, %v3236_v18 }
 0x2bb   : > { %v5896_v39 = vpop.eup %5895  ;;  %v3298_v16 = vrot.slane %v3297_v32, 2  ;;  %v3173_v38 = vmul.f32 %v5894_v36, %v7031_v54  ;;  %v3341_v28 = vmul.f32 0.0625, %v3231_v40 }
 0x2bc   : > { %v3305_v44 = vrot.slane %v3304_v22, 2  ;;  %v3174_v45 = vmul.f32 %v5896_v39, %v7033_v59  ;;  %v5898_v55 = vpop.eup %5897  ;;  %v3342_v61 = vmul.f32 0.0625, %v3238_v43  ;;  %5025 = vmatpush3.bf16.msra.mxu0 %v5770_v26  ;;  %v5747_v43 = vld [vmem:[%s6474_s27 + $0x1c8] sm:$0xff]  }
 0x2bd   : > { %v3299_v47 = vadd.f32 %v3298_v16, %v3297_v32  ;;  %v3239_v0 = vadd.f32 %v3173_v38, %v3163_v33  ;;  %v3183_v57 = vmul.f32 %v5898_v55, %v7036_v1  ;;  %v3361_v48 = vpack.c.bf16 %v3341_v28, %v3341_v28  ;;  %5026 = vmatprep.subr.bf16.mxu0 %v5771_v30  ;;  %v5746_v16 = vld [vmem:[%s6474_s27 + $0x180] sm:$0xff]   ;;  %v5749_v28 = vld [vmem:[%s6474_s27 + $0x1d0] sm:$0xff]   ;;  %v5751_v30 = vld [vmem:[%s6474_s27 + $0x1d8] sm:$0xff]  }
 0x2be   : > { %v3306_v12 = vadd.f32 %v3305_v44, %v3304_v22  ;;  %v3246_v49 = vadd.f32 %v3174_v45, %v3164_v37  ;;  %v3362_v13 = vpack.c.bf16 %v3342_v61, %v3342_v61 }
 0x2bf   : > { %v3300_v58 = vrot.slane %v3299_v47, 1  ;;  %v3240_v56 = vrot.slane %v3239_v0, 4 }
 0x2c0   : > { %v3307_v54 = vrot.slane %v3306_v12, 1  ;;  %v3247_v31 = vrot.slane %v3246_v49, 4  ;;  %5027 = vmatpush3.bf16.msra.mxu0 %v5772_v3  ;;  %v3569_v32 = vunpack.c.l.b16 %v3362_v13  ;;  %v5756_v13 = vld [vmem:[%s6474_s27 + $0x1a8] sm:$0xff]  }
 0x2c1   : > { %v3301_v59 = vadd.f32 %v3300_v58, %v3299_v47  ;;  %v3241_v62 = vadd.f32 %v3240_v56, %v3239_v0  ;;  %5028 = vmatprep.subr.bf16.mxu0 %v5773_v35  ;;  %v5760_v35 = vld [vmem:[%s6474_s27 + $0x1b8] sm:$0xff]  }
 0x2c2   : > { %v5900_v46 = vpop.eup %5899  ;;  %v3248_v63 = vadd.f32 %v3247_v31, %v3246_v49  ;;  %v3308_v23 = vadd.f32 %v3307_v54, %v3306_v12  ;;  %v5748_v49 = vld [vmem:[%s6474_s27 + $0x188] sm:$0xff]   ;;  %v5750_v31 = vld [vmem:[%s6474_s27 + $0x190] sm:$0xff]  }
 0x2c3   : > { %v5902_v50 = vpop.eup %5901  ;;  %v3351_v4 = vmul.f32 0.0625, %v3301_v59  ;;  %v3242_v60 = vrot.slane %v3241_v62, 2  ;;  %v3184_v5 = vmul.f32 %v5900_v46, %v7041_v6  ;;  %v3568_v6 = vunpack.c.l.b16 %v3361_v48 }
 0x2c4   : > { %v5904_v52 = vpop.eup %5903  ;;  %v3249_v7 = vrot.slane %v3248_v63, 2  ;;  %v3193_v9 = vmul.f32 %v5902_v50, %v7043_v53  ;;  %v3352_v2 = vmul.f32 0.0625, %v3308_v23  ;;  %v5775_v53 = vld [vmem:[%s6474_s27 + $0x278] sm:$0xff]   ;;  %5029 = vmatpush3.bf16.msra.mxu0 %v5774_v29 }
 0x2c5   : > { %v3371_v1 = vpack.c.bf16 %v3351_v4, %v3351_v4  ;;  %v3243_v18 = vadd.f32 %v3242_v60, %v3241_v62  ;;  %v3194_v19 = vmul.f32 %v5904_v52, %v7045_v10  ;;  %v5776_v10 = vld [vmem:[%s6474_s27 + $0x238] sm:$0xff]   ;;  %5030 = vmatprep.subr.bf16.mxu0 %v5775_v53  ;;  %v5753_v4 = vld [vmem:[%s6474_s27 + $0x1e0] sm:$0xff]  }
 0x2c6   : > { %v3250_v17 = vadd.f32 %v3249_v7, %v3248_v63  ;;  %v3309_v24 = vadd.f32 %v3193_v9, %v3183_v57  ;;  %v3372_v27 = vpack.c.bf16 %v3352_v2, %v3352_v2  ;;  %v5752_v23 = vld [vmem:[%s6474_s27 + $0x198] sm:$0xff]   ;;  %v5754_v52 = vld [vmem:[%s6474_s27 + $0x1a0] sm:$0xff]   ;;  %v5755_v9 = vld [vmem:[%s6474_s27 + $0x1e8] sm:$0xff]  }
 0x2c7   : > { %v3578_v34 = vunpack.c.l.b16 %v3371_v1  ;;  %v3244_v15 = vrot.slane %v3243_v18, 1  ;;  %v3316_v42 = vadd.f32 %v3194_v19, %v3184_v5  ;;  %v5757_v1 = vld [vmem:[%s6474_s27 + $0x1f0] sm:$0xff]   ;;  %v5759_v19 = vld [vmem:[%s6474_s27 + $0x1f8] sm:$0xff]  }
 0x2c8   : > { %v3251_v41 = vrot.slane %v3250_v17, 1  ;;  %v3310_v20 = vrot.slane %v3309_v24, 4  ;;  %v3579_v33 = vunpack.c.l.b16 %v3372_v27  ;;  %5031 = vmatpush3.bf16.msra.mxu0 %v5776_v10 }
 0x2c9   : > { %v3317_v8 = vrot.slane %v3316_v42, 4  ;;  %v3589_v36 = vsel %vm3584_vm0, %v3578_v34, %v3568_v6  ;;  %v3245_v22 = vadd.f32 %v3244_v15, %v3243_v18  ;;  %v5758_v18 = vld [vmem:[%s6474_s27 + $0x1b0] sm:$0xff]  }
 0x2ca   : > { %v3311_v37 = vadd.f32 %v3310_v20, %v3309_v24  ;;  %v3590_v11 = vsel %vm3584_vm0, %v3579_v33, %v3569_v32  ;;  %v3252_v38 = vadd.f32 %v3251_v41, %v3250_v17  ;;  %v3599_v45 = vpack.c.b16 %v3589_v36, %v3589_v36  ;;  %v694_v24 = vld [vmem:[%s6472_s6 + $0x8] sm:$0x3] }
 0x2cb   : > { %v3318_v39 = vadd.f32 %v3317_v8, %v3316_v42  ;;  %v3600_v40 = vpack.c.b16 %v3590_v11, %v3590_v11  ;;  %v3343_v0 = vmul.f32 0.0625, %v3245_v22  ;;  %v732_v27 = vrot.slane %v694_v24, %v699_v21 }
 0x2cc   : > { %v3312_v44 = vrot.slane %v3311_v37, 2  ;;  %v3344_v26 = vmul.f32 0.0625, %v3252_v38  ;;  %v736_v29 = vrot.slane %v694_v24, %v703_v25 }
 0x2cd   : > { %v3319_v47 = vrot.slane %v3318_v39, 2  ;;  %4207 = vmatprep.mubr.bf16.mxu1 %v3600_v40  ;;  %v3363_v56 = vpack.c.bf16 %v3343_v0, %v3343_v0 }
 0x2ce   : > { %v3313_v51 = vadd.f32 %v3312_v44, %v3311_v37  ;;  %4208 = vmatmul.mubr.bf16.vlgmr.msra.gmra.mrb[24].mxu1 %v3599_v45  ;;  %v3364_v59 = vpack.c.bf16 %v3344_v26, %v3344_v26 }
 0x2cf   : > { %v3320_v12 = vadd.f32 %v3319_v47, %v3318_v39  ;;  %4995 = vmatpush3.bf16.msra.mxu1 %v5746_v16  ;;  %v3570_v63 = vunpack.c.l.b16 %v3363_v56 }
 0x2d0   : > { %v3314_v55 = vrot.slane %v3313_v51, 1  ;;  %4996 = vmatprep.subr.bf16.mxu1 %v5747_v43  ;;  %v3571_v50 = vunpack.c.l.b16 %v3364_v59 }
 0x2d1   : > { %v3321_v58 = vrot.slane %v3320_v12, 1 }
 0x2d2   : > { %v3315_v54 = vadd.f32 %v3314_v55, %v3313_v51 }
 0x2d3   : > { %4997 = vmatpush3.bf16.msra.mxu1 %v5748_v49  ;;  %v3322_v61 = vadd.f32 %v3321_v58, %v3320_v12 }
 0x2d4   : > { %v3353_v62 = vmul.f32 0.0625, %v3315_v54  ;;  %4998 = vmatprep.subr.bf16.mxu1 %v5749_v28 }
 0x2d5   : > { %v3354_v46 = vmul.f32 0.0625, %v3322_v61 }
 0x2d6   : > { %v3373_v57 = vpack.c.bf16 %v3353_v62, %v3353_v62 }
 0x2d7   : > { %4999 = vmatpush3.bf16.msra.mxu1 %v5750_v31  ;;  %v3374_v3 = vpack.c.bf16 %v3354_v46, %v3354_v46 }
 0x2d8   : > { %v3580_v48 = vunpack.c.l.b16 %v3373_v57  ;;  %5000 = vmatprep.subr.bf16.mxu1 %v5751_v30 }
 0x2d9   : > { %v3581_v60 = vunpack.c.l.b16 %v3374_v3 }
 0x2da   : > { %v3591_v5 = vsel %vm3584_vm0, %v3580_v48, %v3570_v63 }
 0x2db   : > { %5001 = vmatpush3.bf16.msra.mxu1 %v5752_v23  ;;  %v3592_v7 = vsel %vm3584_vm0, %v3581_v60, %v3571_v50  ;;  %v3601_v17 = vpack.c.b16 %v3591_v5, %v3591_v5 }
 0x2dc   : > { %5002 = vmatprep.subr.bf16.mxu1 %v5753_v4  ;;  %v3602_v2 = vpack.c.b16 %v3592_v7, %v3592_v7 }
 0x2de   : > { %4247 = vmatprep.mubr.bf16.mxu1 %v3602_v2 }
 0x2df   : > { %5003 = vmatpush3.bf16.msra.mxu1 %v5754_v52 }
 0x2e0   : > { %5004 = vmatprep.subr.bf16.mxu1 %v5755_v9 }
 0x2e3   : > { %5005 = vmatpush3.bf16.msra.mxu1 %v5756_v13 }
 0x2e4   : > { %5006 = vmatprep.subr.bf16.mxu1 %v5757_v1 }
 0x2e7   : > { %5007 = vmatpush3.bf16.msra.mxu1 %v5758_v18 }
 0x2e8   : > { %5008 = vmatprep.subr.bf16.mxu1 %v5759_v19 }
 0x2eb   : > { %5009 = vmatpush3.bf16.msra.mxu1 %v5760_v35 }
 0x2ee   : > { %4248 = vmatmul.mubr.bf16.vlgmr.msra.gmra.mrb[28].mxu1 %v3601_v17 }
 0x30c   : > { %v2898_v6 = vpop.f32.mrb[16].mxu0 }
 0x30d   : > { %v7106_v34 = vadd.f32 %v2898_v6, %v732_v27  ;;  %v2900_v15 = vpop.f32.mrb[17].mxu0 }
 0x30e   : > { %v7108_v42 = vadd.f32 %v2900_v15, %v736_v29  ;;  %v2902_v53 = vpop.f32.mrb[18].mxu0 }
 0x30f   : > { %v4811_v41 = vmul.f32 -1.442695, %v7106_v34  ;;  %v5072_v20 = vadd.f32 %v2902_v53, %v732_v27  ;;  %v2904_v32 = vpop.f32.mrb[19].mxu0 }
 0x310   : > { %v4812_v33 = vmul.f32 -1.442695, %v7108_v42  ;;  %v5073_v10 = vadd.f32 %v2904_v32, %v736_v29 }
 0x311   : > { %5905 = vpow2.f32 %v4811_v41  ;;  %v4821_v8 = vmul.f32 -1.442695, %v5072_v20 }
 0x312   : > { %5907 = vpow2.f32 %v4812_v33  ;;  %v4822_v21 = vmul.f32 -1.442695, %v5073_v10 }
 0x313   : > { %5909 = vpow2.f32 %v4821_v8 }
 0x314   : > { %5911 = vpow2.f32 %v4822_v21  ;;  %v2908_v14 = vpop.f32.mrb[20].mxu0 }
 0x315   : > { %v7112_v25 = vadd.f32 %v2908_v14, %v732_v27  ;;  %v2910_v36 = vpop.f32.mrb[21].mxu0 }
 0x316   : > { %v7114_v22 = vadd.f32 %v2910_v36, %v736_v29  ;;  %v2912_v37 = vpop.f32.mrb[22].mxu0 }
 0x317   : > { %v4831_v11 = vmul.f32 -1.442695, %v7112_v25  ;;  %v5076_v39 = vadd.f32 %v2912_v37, %v732_v27  ;;  %v2914_v40 = vpop.f32.mrb[23].mxu0 }
 0x318   : > { %v4832_v16 = vmul.f32 -1.442695, %v7114_v22  ;;  %v5077_v38 = vadd.f32 %v2914_v40, %v736_v29 }
 0x319   : > { %5913 = vpow2.f32 %v4831_v11  ;;  %v4841_v44 = vmul.f32 -1.442695, %v5076_v39 }
 0x31a   : > { %5915 = vpow2.f32 %v4832_v16  ;;  %v4842_v45 = vmul.f32 -1.442695, %v5077_v38 }
 0x31b   : > { %v5906_v43 = vpop.eup %5905  ;;  %5917 = vpow2.f32 %v4841_v44 }
 0x31c   : > { %v5908_v47 = vpop.eup %5907  ;;  %v3045_v0 = vadd.f32 1.0, %v5906_v43  ;;  %5919 = vpow2.f32 %v4842_v45  ;;  %v4843_v43 = vld [vmem:[%s323_s10] ss:$0 sm:$0xff] }
 0x31d   : > { %v5910_v51 = vpop.eup %5909  ;;  %v3046_v12 = vadd.f32 1.0, %v5908_v47 }
 0x31e   : > { %v5912_v49 = vpop.eup %5911  ;;  %5921 = vrcp.f32 %v3045_v0  ;;  %v3055_v26 = vadd.f32 1.0, %v5910_v51 }
 0x31f   : > { %5923 = vrcp.f32 %v3046_v12  ;;  %v3056_v55 = vadd.f32 1.0, %v5912_v49 }
 0x320   : > { %5925 = vrcp.f32 %v3055_v26 }
 0x321   : > { %5927 = vrcp.f32 %v3056_v55  ;;  %v4944_v28 = vpop.f32.mrb[16].mxu1 }
 0x322   : > { %v4945_v58 = vpop.f32.mrb[17].mxu1 }
 0x323   : > { %v5914_v56 = vpop.eup %5913  ;;  %v7118_v54 = vadd.f32 %v4945_v58, %v4944_v28  ;;  %v4947_v31 = vpop.f32.mrb[18].mxu1 }
 0x324   : > { %v5916_v61 = vpop.eup %5915  ;;  %v3065_v59 = vadd.f32 1.0, %v5914_v56  ;;  %v4948_v62 = vpop.f32.mrb[19].mxu1 }
 0x325   : > { %v5918_v30 = vpop.eup %5917  ;;  %v3066_v46 = vadd.f32 1.0, %v5916_v61  ;;  %v4130_v28 = vadd.f32 %v7118_v54, %v4843_v43 }
 0x326   : > { %v5920_v63 = vpop.eup %5919  ;;  %5929 = vrcp.f32 %v3065_v59  ;;  %v3075_v57 = vadd.f32 1.0, %v5918_v30 }
 0x327   : > { %5931 = vrcp.f32 %v3066_v46  ;;  %v3076_v23 = vadd.f32 1.0, %v5920_v63 }
 0x328   : > { %v5922_v3 = vpop.eup %5921  ;;  %5933 = vrcp.f32 %v3075_v57 }
 0x329   : > { %v5924_v50 = vpop.eup %5923  ;;  %5935 = vrcp.f32 %v3076_v23  ;;  %v3165_v60 = vmul.f32 %v5922_v3, %v7106_v34 }
 0x32a   : > { %v5926_v48 = vpop.eup %5925  ;;  %v3166_v52 = vmul.f32 %v5924_v50, %v7108_v42 }
 0x32b   : > { %v5928_v4 = vpop.eup %5927  ;;  %v3175_v5 = vmul.f32 %v5926_v48, %v5072_v20 }
 0x32c   : > { %v3176_v7 = vmul.f32 %v5928_v4, %v5073_v10 }
 0x32d   : > { %v3253_v9 = vadd.f32 %v3175_v5, %v3165_v60 }
 0x32e   : > { %v3260_v2 = vadd.f32 %v3176_v7, %v3166_v52 }
 0x32f   : > { %v3254_v13 = vrot.slane %v3253_v9, 4 }
 0x330   : > { %v5930_v1 = vpop.eup %5929  ;;  %v3261_v18 = vrot.slane %v3260_v2, 4 }
 0x331   : > { %v5932_v19 = vpop.eup %5931  ;;  %v3255_v35 = vadd.f32 %v3254_v13, %v3253_v9  ;;  %v3185_v6 = vmul.f32 %v5930_v1, %v7112_v25 }
 0x332   : > { %v5934_v17 = vpop.eup %5933  ;;  %v3262_v24 = vadd.f32 %v3261_v18, %v3260_v2  ;;  %v3186_v34 = vmul.f32 %v5932_v19, %v7114_v22 }
 0x333   : > { %v5936_v27 = vpop.eup %5935  ;;  %v3256_v29 = vrot.slane %v3255_v35, 2  ;;  %v3195_v15 = vmul.f32 %v5934_v17, %v5076_v39 }
 0x334   : > { %v3263_v53 = vrot.slane %v3262_v24, 2  ;;  %v3196_v41 = vmul.f32 %v5936_v27, %v5077_v38 }
 0x335   : > { %v3257_v42 = vadd.f32 %v3256_v29, %v3255_v35  ;;  %v3323_v20 = vadd.f32 %v3195_v15, %v3185_v6 }
 0x336   : > { %v3264_v32 = vadd.f32 %v3263_v53, %v3262_v24  ;;  %v3330_v33 = vadd.f32 %v3196_v41, %v3186_v34 }
 0x337   : > { %v3258_v10 = vrot.slane %v3257_v42, 1  ;;  %v3324_v8 = vrot.slane %v3323_v20, 4 }
 0x338   : > { %v3265_v21 = vrot.slane %v3264_v32, 1  ;;  %v3331_v14 = vrot.slane %v3330_v33, 4 }
 0x339   : > { %v3325_v36 = vadd.f32 %v3324_v8, %v3323_v20  ;;  %v3259_v11 = vadd.f32 %v3258_v10, %v3257_v42 }
 0x33a   : > { %v3332_v37 = vadd.f32 %v3331_v14, %v3330_v33  ;;  %v3266_v25 = vadd.f32 %v3265_v21, %v3264_v32 }
 0x33b   : > { %v3326_v40 = vrot.slane %v3325_v36, 2  ;;  %v3345_v45 = vmul.f32 0.0625, %v3259_v11 }
 0x33c   : > { %v3333_v16 = vrot.slane %v3332_v37, 2  ;;  %v3346_v47 = vmul.f32 0.0625, %v3266_v25 }
 0x33d   : > { %v3327_v39 = vadd.f32 %v3326_v40, %v3325_v36  ;;  %v3365_v26 = vpack.c.bf16 %v3345_v45, %v3345_v45 }
 0x33e   : > { %v3334_v44 = vadd.f32 %v3333_v16, %v3332_v37  ;;  %v3366_v59 = vpack.c.bf16 %v3346_v47, %v3346_v47 }
 0x33f   : > { %v3328_v22 = vrot.slane %v3327_v39, 1  ;;  %v3572_v63 = vunpack.c.l.b16 %v3365_v26 }
 0x340   : > { %v3335_v38 = vrot.slane %v3334_v44, 1  ;;  %v3573_v23 = vunpack.c.l.b16 %v3366_v59 }
 0x341   : > { %v3329_v0 = vadd.f32 %v3328_v22, %v3327_v39  ;;  %v4966_v51 = vpop.f32.mrb[20].mxu1 }
 0x342   : > { %v4967_v12 = vpop.f32.mrb[21].mxu1  ;;  %v3336_v49 = vadd.f32 %v3335_v38, %v3334_v44 }
 0x343   : > { %v3355_v55 = vmul.f32 0.0625, %v3329_v0  ;;  %v4968_v58 = vadd.f32 %v4967_v12, %v4966_v51  ;;  %v4969_v56 = vpop.f32.mrb[22].mxu1 }
 0x344   : > { %v4970_v31 = vpop.f32.mrb[23].mxu1  ;;  %v3356_v61 = vmul.f32 0.0625, %v3336_v49 }
 0x345   : > { %v3375_v62 = vpack.c.bf16 %v3355_v55, %v3355_v55  ;;  %v4170_v30 = vadd.f32 %v4968_v58, %v4130_v28 }
 0x346   : > { %v3376_v46 = vpack.c.bf16 %v3356_v61, %v3356_v61 }
 0x347   : > { %v3582_v57 = vunpack.c.l.b16 %v3375_v62 }
 0x348   : > { %v3583_v3 = vunpack.c.l.b16 %v3376_v46 }
 0x349   : > { %v3593_v50 = vsel %vm3584_vm0, %v3582_v57, %v3572_v63 }
 0x34a   : > { %v3594_v48 = vsel %vm3584_vm0, %v3583_v3, %v3573_v23  ;;  %v3603_v60 = vpack.c.b16 %v3593_v50, %v3593_v50 }
 0x34b   : > { %v3604_v4 = vpack.c.b16 %v3594_v48, %v3594_v48 }
 0x34d   : > { %4287 = vmatprep.mubr.bf16.mxu0 %v3604_v4 }
 0x34e   : > { %4288 = vmatmul.mubr.bf16.vlgmr.msra.gmra.mrb[24].mxu0 %v3603_v60 }
 0x3a1   : > { %v4988_v54 = vpop.f32.mrb[24].mxu1 }
 0x3a2   : > { %v4989_v5 = vpop.f32.mrb[25].mxu1 }
 0x3a3   : > { %v4990_v52 = vadd.f32 %v4989_v5, %v4988_v54  ;;  %v4991_v7 = vpop.f32.mrb[26].mxu1 }
 0x3a4   : > { %v4992_v9 = vpop.f32.mrb[27].mxu1 }
 0x3a5   : > { %v4210_v2 = vadd.f32 %v4990_v52, %v4170_v30 }
 0x3c1   : > { %v5010_v13 = vpop.f32.mrb[28].mxu1 }
 0x3c2   : > { %v5011_v1 = vpop.f32.mrb[29].mxu1 }
 0x3c3   : > { %v5012_v18 = vadd.f32 %v5011_v1, %v5010_v13  ;;  %v5013_v19 = vpop.f32.mrb[30].mxu1 }
 0x3c4   : > { %v5014_v35 = vpop.f32.mrb[31].mxu1 }
 0x3c5   : > { %v4250_v17 = vadd.f32 %v5012_v18, %v4210_v2 }
 0x421   : > { %v5032_v24 = vpop.f32.mrb[24].mxu0 }
 0x422   : > { %v5033_v27 = vpop.f32.mrb[25].mxu0 }
 0x423   : > { %v5034_v29 = vadd.f32 %v5033_v27, %v5032_v24  ;;  %v5035_v6 = vpop.f32.mrb[26].mxu0 }
 0x424   : > { %v5036_v15 = vpop.f32.mrb[27].mxu0 }
 0x425   : > { %v4290_v53 = vadd.f32 %v5034_v29, %v4250_v17 }
 0x427   : > { %v4296_v34 = vsel %vm4295_vm1, %v4290_v53, -inf }
 0x428   : > { %4297 = vmax.xlane.f32.xlu0 %v4296_v34 }
 0x4b5   : > { %v4298_v41 = vpop.xlane.xlu0 %4297 }
 0x4b6   : > { %v4299_v42 = vsub.f32 %v4290_v53, %v4298_v41 }
 0x4b8   : > { %v4300_v20 = vmul.f32 1.442695, %v4299_v42 }
 0x4ba   : > { %5937 = vpow2.f32 %v4300_v20 }
 0x4c4   : > { %v5938_v32 = vpop.eup %5937 }
 0x4c5   : > { %v4302_v33 = vsel %vm4295_vm1, %v5938_v32, 0.0 }
 0x4c6   : > { %4303 = vadd.xlane.f32.xlu0 %v4302_v33 }
 0x553   : > { %v4304_v10 = vpop.xlane.xlu0 %4303 }
 0x554   : > { %5939 = vrcp.f32 %v4304_v10 }
 0x55e   : > { %v5940_v8 = vpop.eup %5939 }
 0x55f   : > { %v4306_v21 = vmul.f32 %v5940_v8, %v5938_v32 }
 0x561   : > { %4307 = vst [vmem:[%s363_s22] sm:$0x3] %v4306_v21 }
 0x562   : > { %6110 = shalt.err (!%p6107_p13)
}
 0x563   : > { %s6111_s24 = scalar_lea.hbm %s7133_s23, 32  ;;  %s6115_s9 = scalar_lea.hbm %s7181_s5, 224 }
 0x564   : > { %p6112_p4 = scmp.ne.s32.totalorder %s7133_s23, %s6111_s24  ;;  %p6116_p7 = scmp.lt.u32.totalorder %s7133_s23, %s7181_s5 }
 0x565   : > { %p6117_p6 = scmp.lt.u32.totalorder %s6115_s9, %s6111_s24  ;;  %p6119_p10 = scmp.lt.u32.totalorder %s6111_s24, %s7133_s23 }
 0x566   : > { %p6113_p12 = pnand %p6112_p4, %p7222_p9 }
 0x567   : > { %p6118_p8 = por %p6117_p6, %p6116_p7 }
 0x568   : > { %p6114_p3 = pneg %p6113_p12 }
 0x569   : > { %p6120_p1 = por %p6119_p10, %p6118_p8 }
 0x56b   : > { %p6121_p5 = pnand %p6120_p1, %p6114_p3 }
 0x56d   : > { %6124 = shalt.err (!%p6121_p5)
}
 0x56e   : > { %5139 = dma.vmem_to_hbm [thread:$0]  (%p7222_p9), %s7135_s21, 32, %s7133_s23, %s4309_s14  }
 0x56f PF: > { %s7223_s1 = sld [smem:[#allocation18_spill]]  ;;  %s7224_s18 = sld [smem:[#allocation16_spill]] }
 0x570   : > { %s7225_s28 = sld [smem:[#allocation21_spill]] }
 0x575   : > { %p5165_p2 = scmp.ge.s32.totalorder %s7223_s1, 2  ;;  %s4334_s6 = sand.u32 1, %s7224_s18  }
 0x576   : > { %p7226_p11 = scmp.ne.s32.totalorder %s7225_s28, 0  ;;  %s4335_s7 = scalar_lea.sflag [#allocation4], %s4334_s6 }
 0x578   : > { %p5159_p0 = pnand %p5165_p2, %p7226_p11 }
 0x57a   : > { %6154 = dma.done.wait (!%p5159_p0), %s4335_s7, 32  }
 0x57b   : > { %6156 = vsyncadd (!%p5159_p0), %s4335_s7, 4294967264  ;;  %s7227_s21 = sld [smem:[#allocation19_spill]]  ;;  %s7228_s27 = sld [smem:[#allocation17_spill]] }
 0x57c   : > { %s7229_s20 = sld [smem:[#allocation20_spill]]  ;;  %s7230_s18 = smov %s6163_s19 }
 0x581   : > { %p22_p13 = scmp.ge.s32.totalorder %s7227_s21, 9   ;;  %s7231_s19 = smov %s7228_s27 }
 0x583   :  { %24 = sbr.rel (!%p22_p13) target bundleno = 11 (0xb), region = 125 }
 0x58a   :  { %4340 = vsyncpa [#allocation3], 1 }
 0x58b   :  { %4342 = vsyncpa [#allocation3 + $0x1], 1 }
 0x58c   :  { %4343 = vsyncpa [#allocation6], 1 }
 0x58d   :  { %4345 = vsyncpa [#allocation6 + $0x1], 1 }
 0x58e   :  { %4346 = vsyncpa [#allocation9], 1 }
 0x58f   :  { %4348 = vsyncpa [#allocation9 + $0x1], 1 }
 0x590   :  { %4349 = vsyncpa [#allocation4], 1 }
 0x591   :  { %4351 = vsyncpa [#allocation4 + $0x1], 1 }

</bundles_post_ra>
